<compile_context>
chip_gen: v7x
topology: tpu7x:2x2x1
jax: 0.10.0
libtpu: 0.0.40
codegen_flags: <defaults>
</compile_context>

<pallas_src>
import functools
import math

import numpy as np
import jax
import jax.numpy as jnp
from jax.experimental import pallas as pl
from jax.experimental.pallas import tpu as pltpu

KSIZE = 15            # kernel size from the module (__init__ default)
NUM_SIGMAS = 400      # kernel_tensor_generate(): linspace(0, 3, 401)[1:]
MAX_ITERS = 6         # torch.randint(7) -> 0..6 iterations

_erf = np.vectorize(math.erf)


def _norm_cdf(x):
    return 0.5 * (1.0 + _erf(x / math.sqrt(2.0)))


# ----------------------------------------------------------------------------
# Gaussian kernel construction (numpy, matches the PyTorch helpers exactly).
# ----------------------------------------------------------------------------
def _gauss_k1d_np(size, sigma):
    interval = (2 * sigma + 1.0) / size
    x = np.linspace(-sigma - interval / 2, sigma + interval / 2, size + 1)
    return np.diff(_norm_cdf(x))                     # non-negative, (size,)


def gauss_kernel_np(size=KSIZE, sigma=3.0):
    """Full 2-D kernel exactly as in the PyTorch gauss_kernel()."""
    ker1d = _gauss_k1d_np(size, sigma)
    kernel_raw = np.sqrt(np.outer(ker1d, ker1d))
    return (kernel_raw / kernel_raw.sum()).astype(np.float32)


def gauss_1d_bank_np(size=KSIZE):
    """1-D separable factors g with outer(g, g) == 2-D kernel exactly."""
    sigma_list = np.linspace(0.0, 3.0, num=NUM_SIGMAS + 1)[1:]
    bank = []
    for s in sigma_list:
        sq = np.sqrt(_gauss_k1d_np(size, s))
        bank.append((sq / sq.sum()).astype(np.float32))
    return np.stack(bank, axis=0)                    # (400, size) f32


# ----------------------------------------------------------------------------
# In-kernel construction of the conv+reflection matrices from the 1-D taps.
# ----------------------------------------------------------------------------
def _build_conv_matrix(n, pad, gvals, transpose):
    """Dense (n, n) matrix folding the 1-D taps with ReflectionPad.

    transpose=False:  M[r, c] = sum_i g[i] * [refl(r + i) == c]   (out = M @ x)
    transpose=True :  M[c, o] = sum_i g[i] * [refl(o + i) == c]   (out = x @ M)
    """
    out_idx = jax.lax.broadcasted_iota(jnp.int32, (n, n), 1 if transpose else 0)
    in_idx = jax.lax.broadcasted_iota(jnp.int32, (n, n), 0 if transpose else 1)
    m = jnp.zeros((n, n), jnp.float32)
    for i, gi in enumerate(gvals):
        p = out_idx + i                              # padded position
        refl = jnp.where(
            p < pad, pad - p,
            jnp.where(p < n + pad, p - pad, 2 * (n - 1) + pad - p))
        m = m + jnp.where(refl == in_idx, gi, 0.0)
    return m


# ----------------------------------------------------------------------------
# Pallas kernel: all propagation iterations fused, init resident in VMEM.
# ----------------------------------------------------------------------------
def _propagate_kernel(iters_ref, g_ref, m_ref, conf_ref, init_sc, omm_sc,
                      *, nb, H, W, ksize, pad):
    # iters_ref: (1,)            SMEM int32 — dynamic trip count (0..MAX_ITERS)
    # g_ref   : (MAX_ITERS, 15)  SMEM f32   — per-iteration 1-D Gaussian taps
    # m_ref   : (nb, H, W)       VMEM       — mask block (resident across t)
    # conf_ref: (nb, H, W)       VMEM       — output block, revisited across t
    # init_sc : (nb, H, W)       VMEM scratch — `init` carried across t
    # omm_sc  : (nb, H, W)       VMEM scratch — hoisted (1 - mask)
    t = pl.program_id(1)
    iters = iters_ref[0]

    @pl.when(t == 0)
    def _init():
        omm = 1.0 - m_ref[...]
        omm_sc[...] = omm
        init_sc[...] = omm

    # iter_rand == 0: observable result is all zeros (see wrapper TODO).
    @pl.when(jnp.logical_and(t == 0, iters == 0))
    def _zero():
        conf_ref[...] = jnp.zeros_like(conf_ref)

    @pl.when(t < iters)
    def _step():
        gvals = [g_ref[t, i] for i in range(ksize)]          # SMEM scalar taps
        mv = _build_conv_matrix(H, pad, gvals, transpose=False)   # (H, H)
        mhT = _build_conv_matrix(W, pad, gvals, transpose=True)   # (W, W)

        # Horizontal pass: batch folded into the matmul M dimension.
        x = init_sc[...].reshape(nb * H, W)
        y = jnp.dot(x, mhT, preferred_element_type=jnp.float32)   # (nb*H, W)
        # Vertical pass: one 2-D MXU matmul per batch element in the block.
        rows = [jnp.dot(mv, y[n * H:(n + 1) * H, :],
                        preferred_element_type=jnp.float32)
                for n in range(nb)]
        conv = rows[0][None] if nb == 1 else jnp.stack(rows, axis=0)

        conf = conv * m_ref[...]
        init_sc[...] = conf + omm_sc[...]

        @pl.when(t == iters - 1)       # write the output exactly once
        def _store():
            conf_ref[...] = conf


def _fused_propagate(iters, g_sel, mask_nhw, *, nb, num_blocks, size):
    n_tot, H, W = mask_nhw.shape
    T = g_sel.shape[0]
    pad = size // 2
    kernel = functools.partial(_propagate_kernel,
                               nb=nb, H=H, W=W, ksize=size, pad=pad)
    # TODO(synk): for large images (H,W >~ 1k) set vmem_limit_bytes explicitly
    # and tile H into row blocks — the dense HxH/WxW fold exceeds v7x's 64 MiB
    # VMEM around H=W~1.2k; a banded (15-wide) formulation is needed beyond.
    # TODO(synk): W=16 stores are lane-masked (16/128); pack W into the lane
    # axis (pad W to 128 / flatten H*W) if the store path ever dominates.
    return pl.pallas_call(
        kernel,
        out_shape=jax.ShapeDtypeStruct((n_tot, H, W), jnp.float32),
        grid=(num_blocks, T),
        in_specs=[
            pl.BlockSpec(memory_space=pltpu.MemorySpace.SMEM),   # iters (1,)
            pl.BlockSpec(memory_space=pltpu.MemorySpace.SMEM),   # g_sel (T, 15)
            pl.BlockSpec((nb, H, W), lambda b, t: (b, 0, 0)),    # mask
        ],
        out_specs=pl.BlockSpec((nb, H, W), lambda b, t: (b, 0, 0)),
        scratch_shapes=[pltpu.VMEM((nb, H, W), jnp.float32),     # init
                        pltpu.VMEM((nb, H, W), jnp.float32)],    # 1 - mask
        compiler_params=pltpu.CompilerParams(
            dimension_semantics=("parallel", "arbitrary")),
    )(iters, g_sel, mask_nhw)


def _forward_impl(g_bank, mask, iters, kidx, *, size):
    N, C, H, W = mask.shape
    assert C == 1, "module's conv kernel is 1-in / 1-out"
    pad = size // 2
    assert H > pad and W > pad, "ReflectionPad2d(pad) requires H, W > pad"
    num_blocks = 2 if N >= 2 else 1     # >= 2 'parallel' blocks for v7x's 2 TCs
    nb = -(-N // num_blocks)
    n_pad = nb * num_blocks
    m = mask[:, 0].astype(jnp.float32)
    if n_pad != N:
        m = jnp.concatenate(
            [m, jnp.zeros((n_pad - N, H, W), jnp.float32)], axis=0)
    g_sel = g_bank[kidx].astype(jnp.float32)       # (MAX_ITERS, size) gather
    conf = _fused_propagate(iters.astype(jnp.int32), g_sel, m,
                            nb=nb, num_blocks=num_blocks, size=size)
    return conf[:N, None]                          # back to NCHW


# ----------------------------------------------------------------------------
# Module wrapper.
# ----------------------------------------------------------------------------
class ConfidenceDrivenMaskLayerInputIter:
    def __init__(self, size=KSIZE):
        self.size = size
        self.g_bank = jnp.asarray(gauss_1d_bank_np(size))      # (400, size)
        self.kernel_num = int(self.g_bank.shape[0])
        self._forward = jax.jit(functools.partial(_forward_impl, size=size))

    def __call__(self, mask, key):
        # Fully device-side: no host sync on the random trip count.
        # TODO(synk): the PyTorch module returns the python scalar 0.0 when
        # iter_rand == 0; here that case yields an all-zeros (N,1,H,W) array so
        # the call never blocks on a device->host transfer.
        k_iter, k_sel = jax.random.split(key)
        iters = jax.random.randint(k_iter, (1,), 0, MAX_ITERS + 1,
                                   dtype=jnp.int32)
        kidx = jax.random.randint(k_sel, (MAX_ITERS,), 0, self.kernel_num,
                                  dtype=jnp.int32)
        return self._forward(self.g_bank, mask, iters, kidx)


# ----------------------------------------------------------------------------
# Pure-JAX reference (reflect pad + full 15x15 conv, the original formulation).
# ----------------------------------------------------------------------------
def _ref_forward(mask_nhw, kidx_list, size=KSIZE):
    sigma_list = np.linspace(0.0, 3.0, num=NUM_SIGMAS + 1)[1:]
    pad = size // 2
    init = 1.0 - mask_nhw
    conf = jnp.zeros_like(mask_nhw)
    for ki in kidx_list:
        k2d = jnp.asarray(gauss_kernel_np(size, float(sigma_list[int(ki)])))
        x_pad = jnp.pad(init, ((0, 0), (pad, pad), (pad, pad)), mode="reflect")
        out = jax.lax.conv_general_dilated(
            x_pad[:, None], k2d[None, None], (1, 1), "VALID",
            precision=jax.lax.Precision.HIGHEST)[:, 0]
        conf = out * mask_nhw
        init = conf + (1.0 - mask_nhw)
    return conf


if __name__ == "__main__":
    key = jax.random.PRNGKey(0)
    k_mask, k_fwd = jax.random.split(key)

    N, C, H, W = 2, 1, 16, 16
    mask = (jax.random.uniform(k_mask, (N, C, H, W)) > 0.5).astype(jnp.float32)

    layer = ConfidenceDrivenMaskLayerInputIter(size=KSIZE)

    # --- correctness: dynamic trip counts vs reflect-pad + 2-D conv reference
    kidx = jnp.asarray([10, 200, 399, 3, 57, 321], jnp.int32)
    m_nhw = mask[:, 0]
    for it in (6, 3):
        conf_pl = jax.block_until_ready(
            layer._forward(layer.g_bank, mask,
                           jnp.asarray([it], jnp.int32), kidx))
        conf_ref = _ref_forward(
            m_nhw, [int(k) for k in np.asarray(kidx)[:it]], size=KSIZE)
        assert jnp.allclose(conf_pl[:, 0], conf_ref, atol=2e-4, rtol=2e-4), it

    # iter_rand == 0 path -> all zeros, same compiled executable
    conf0 = jax.block_until_ready(
        layer._forward(layer.g_bank, mask, jnp.asarray([0], jnp.int32), kidx))
    assert jnp.all(conf0 == 0.0)

    # --- full forward: random iter count / kernel choice, no host sync ------
    out = jax.block_until_ready(layer(mask, k_fwd))
    assert out.shape == (N, 1, H, W)

    print("KERNEL_OK")
</pallas_src>

<mosaic_0001>
module attributes {stable_mosaic.version = 11 : i64} {
  func.func @_propagate_kernel(%arg0: i32, %arg1: i32, %arg2: memref<1xi32, #tpu.memory_space<smem>>, %arg3: memref<6x15xf32, #tpu.memory_space<smem>>, %arg4: memref<1x16x16xf32, #tpu.memory_space<vmem>>, %arg5: memref<1x16x16xf32, #tpu.memory_space<vmem>>, %arg6: memref<1x16x16xf32, #tpu.memory_space<vmem>>, %arg7: memref<1x16x16xf32, #tpu.memory_space<vmem>>) attributes {dimension_semantics = [#tpu.dimension_semantics<parallel>, #tpu.dimension_semantics<arbitrary>], iteration_bounds = array<i64: 2, 6>, scalar_prefetch = 0 : i64, scratch_operands = 2 : i64, tpu.core_type = #tpu.core_type<tc>, window_params = [{transform_indices = @transform_0, window_bounds = array<i64: 1>}, {transform_indices = @transform_1, window_bounds = array<i64: 6, 15>}, {transform_indices = @transform_2, window_bounds = array<i64: 1, 16, 16>}, {transform_indices = @transform_3, window_bounds = array<i64: 1, 16, 16>}]} {
    %c0 = arith.constant 0 : index
    %0 = memref.load %arg2[%c0] : memref<1xi32, #tpu.memory_space<smem>>
    %c0_i32 = arith.constant 0 : i32
    %1 = arith.cmpi eq, %arg1, %c0_i32 : i32
    %2 = arith.extui %1 : i1 to i32
    %c0_i32_0 = arith.constant 0 : i32
    %3 = arith.cmpi ne, %2, %c0_i32_0 : i32
    scf.if %3 {
      %c0_5 = arith.constant 0 : index
      %c0_6 = arith.constant 0 : index
      %c0_7 = arith.constant 0 : index
      %12 = vector.load %arg4[%c0_5, %c0_6, %c0_7] : memref<1x16x16xf32, #tpu.memory_space<vmem>>, vector<1x16x16xf32>
      %cst = arith.constant 1.000000e+00 : f32
      %13 = vector.broadcast %cst : f32 to vector<1x16x16xf32>
      %14 = arith.subf %13, %12 : vector<1x16x16xf32>
      %c0_8 = arith.constant 0 : index
      %c0_9 = arith.constant 0 : index
      %c0_10 = arith.constant 0 : index
      %15 = vector.load %arg7[%c0_8, %c0_9, %c0_10] : memref<1x16x16xf32, #tpu.memory_space<vmem>>, vector<1x16x16xf32>
      tpu.vector_store %arg7[%c0_8, %c0_9, %c0_10], %14 {strides = array<i32>} : memref<1x16x16xf32, #tpu.memory_space<vmem>>, vector<1x16x16xf32>,
      %c0_11 = arith.constant 0 : index
      %c0_12 = arith.constant 0 : index
      %c0_13 = arith.constant 0 : index
      %16 = vector.load %arg6[%c0_11, %c0_12, %c0_13] : memref<1x16x16xf32, #tpu.memory_space<vmem>>, vector<1x16x16xf32>
      tpu.vector_store %arg6[%c0_11, %c0_12, %c0_13], %14 {strides = array<i32>} : memref<1x16x16xf32, #tpu.memory_space<vmem>>, vector<1x16x16xf32>,
    } else {
    }
    %c0_i32_1 = arith.constant 0 : i32
    %4 = arith.cmpi eq, %arg1, %c0_i32_1 : i32
    %c0_i32_2 = arith.constant 0 : i32
    %5 = arith.cmpi eq, %0, %c0_i32_2 : i32
    %6 = arith.andi %4, %5 : i1
    %7 = arith.extui %6 : i1 to i32
    %c0_i32_3 = arith.constant 0 : i32
    %8 = arith.cmpi ne, %7, %c0_i32_3 : i32
    scf.if %8 {
      %cst = arith.constant 0.000000e+00 : f32
      %12 = vector.broadcast %cst : f32 to vector<1x16x16xf32>
      %c0_5 = arith.constant 0 : index
      %c0_6 = arith.constant 0 : index
      %c0_7 = arith.constant 0 : index
      %13 = vector.load %arg5[%c0_5, %c0_6, %c0_7] : memref<1x16x16xf32, #tpu.memory_space<vmem>>, vector<1x16x16xf32>
      tpu.vector_store %arg5[%c0_5, %c0_6, %c0_7], %12 {strides = array<i32>} : memref<1x16x16xf32, #tpu.memory_space<vmem>>, vector<1x16x16xf32>,
    } else {
    }
    %9 = arith.cmpi slt, %arg1, %0 : i32
    %10 = arith.extui %9 : i1 to i32
    %c0_i32_4 = arith.constant 0 : i32
    %11 = arith.cmpi ne, %10, %c0_i32_4 : i32
    scf.if %11 {
      %12 = arith.index_cast %arg1 : i32 to index
      %c0_5 = arith.constant 0 : index
      %13 = memref.load %arg3[%12, %c0_5] : memref<6x15xf32, #tpu.memory_space<smem>>
      %14 = arith.index_cast %arg1 : i32 to index
      %c1 = arith.constant 1 : index
      %15 = memref.load %arg3[%14, %c1] : memref<6x15xf32, #tpu.memory_space<smem>>
      %16 = arith.index_cast %arg1 : i32 to index
      %c2 = arith.constant 2 : index
      %17 = memref.load %arg3[%16, %c2] : memref<6x15xf32, #tpu.memory_space<smem>>
      %18 = arith.index_cast %arg1 : i32 to index
      %c3 = arith.constant 3 : index
      %19 = memref.load %arg3[%18, %c3] : memref<6x15xf32, #tpu.memory_space<smem>>
      %20 = arith.index_cast %arg1 : i32 to index
      %c4 = arith.constant 4 : index
      %21 = memref.load %arg3[%20, %c4] : memref<6x15xf32, #tpu.memory_space<smem>>
      %22 = arith.index_cast %arg1 : i32 to index
      %c5 = arith.constant 5 : index
      %23 = memref.load %arg3[%22, %c5] : memref<6x15xf32, #tpu.memory_space<smem>>
      %24 = arith.index_cast %arg1 : i32 to index
      %c6 = arith.constant 6 : index
      %25 = memref.load %arg3[%24, %c6] : memref<6x15xf32, #tpu.memory_space<smem>>
      %26 = arith.index_cast %arg1 : i32 to index
      %c7 = arith.constant 7 : index
      %27 = memref.load %arg3[%26, %c7] : memref<6x15xf32, #tpu.memory_space<smem>>
      %28 = arith.index_cast %arg1 : i32 to index
      %c8 = arith.constant 8 : index
      %29 = memref.load %arg3[%28, %c8] : memref<6x15xf32, #tpu.memory_space<smem>>
      %30 = arith.index_cast %arg1 : i32 to index
      %c9 = arith.constant 9 : index
      %31 = memref.load %arg3[%30, %c9] : memref<6x15xf32, #tpu.memory_space<smem>>
      %32 = arith.index_cast %arg1 : i32 to index
      %c10 = arith.constant 10 : index
      %33 = memref.load %arg3[%32, %c10] : memref<6x15xf32, #tpu.memory_space<smem>>
      %34 = arith.index_cast %arg1 : i32 to index
      %c11 = arith.constant 11 : index
      %35 = memref.load %arg3[%34, %c11] : memref<6x15xf32, #tpu.memory_space<smem>>
      %36 = arith.index_cast %arg1 : i32 to index
      %c12 = arith.constant 12 : index
      %37 = memref.load %arg3[%36, %c12] : memref<6x15xf32, #tpu.memory_space<smem>>
      %38 = arith.index_cast %arg1 : i32 to index
      %c13 = arith.constant 13 : index
      %39 = memref.load %arg3[%38, %c13] : memref<6x15xf32, #tpu.memory_space<smem>>
      %40 = arith.index_cast %arg1 : i32 to index
      %c14 = arith.constant 14 : index
      %41 = memref.load %arg3[%40, %c14] : memref<6x15xf32, #tpu.memory_space<smem>>
      %42 = tpu.iota {dimensions = array<i32: 0>} : vector<16x16xi32>
      %43 = tpu.iota {dimensions = array<i32: 1>} : vector<16x16xi32>
      %cst = arith.constant 0.000000e+00 : f32
      %44 = vector.broadcast %cst : f32 to vector<16x16xf32>
      %c0_i32_6 = arith.constant 0 : i32
      %45 = vector.broadcast %c0_i32_6 : i32 to vector<16x16xi32>
      %46 = arith.addi %42, %45 : vector<16x16xi32>
      %c7_i32 = arith.constant 7 : i32
      %47 = vector.broadcast %c7_i32 : i32 to vector<16x16xi32>
      %48 = arith.cmpi slt, %46, %47 : vector<16x16xi32>
      %c7_i32_7 = arith.constant 7 : i32
      %49 = vector.broadcast %c7_i32_7 : i32 to vector<16x16xi32>
      %50 = arith.subi %49, %46 : vector<16x16xi32>
      %c23_i32 = arith.constant 23 : i32
      %51 = vector.broadcast %c23_i32 : i32 to vector<16x16xi32>
      %52 = arith.cmpi slt, %46, %51 : vector<16x16xi32>
      %c7_i32_8 = arith.constant 7 : i32
      %53 = vector.broadcast %c7_i32_8 : i32 to vector<16x16xi32>
      %54 = arith.subi %46, %53 : vector<16x16xi32>
      %c37_i32 = arith.constant 37 : i32
      %55 = vector.broadcast %c37_i32 : i32 to vector<16x16xi32>
      %56 = arith.subi %55, %46 : vector<16x16xi32>
      %57 = arith.select %52, %54, %56 : vector<16x16xi1>, vector<16x16xi32>
      %58 = arith.select %48, %50, %57 : vector<16x16xi1>, vector<16x16xi32>
      %59 = arith.cmpi eq, %58, %43 : vector<16x16xi32>
      %cst_9 = arith.constant 0.000000e+00 : f32
      %60 = vector.broadcast %13 : f32 to vector<16x16xf32>
      %61 = vector.broadcast %cst_9 : f32 to vector<16x16xf32>
      %62 = arith.select %59, %60, %61 : vector<16x16xi1>, vector<16x16xf32>
      %63 = arith.addf %44, %62 : vector<16x16xf32>
      %c1_i32 = arith.constant 1 : i32
      %64 = vector.broadcast %c1_i32 : i32 to vector<16x16xi32>
      %65 = arith.addi %42, %64 : vector<16x16xi32>
      %c7_i32_10 = arith.constant 7 : i32
      %66 = vector.broadcast %c7_i32_10 : i32 to vector<16x16xi32>
      %67 = arith.cmpi slt, %65, %66 : vector<16x16xi32>
      %c7_i32_11 = arith.constant 7 : i32
      %68 = vector.broadcast %c7_i32_11 : i32 to vector<16x16xi32>
      %69 = arith.subi %68, %65 : vector<16x16xi32>
      %c23_i32_12 = arith.constant 23 : i32
      %70 = vector.broadcast %c23_i32_12 : i32 to vector<16x16xi32>
      %71 = arith.cmpi slt, %65, %70 : vector<16x16xi32>
      %c7_i32_13 = arith.constant 7 : i32
      %72 = vector.broadcast %c7_i32_13 : i32 to vector<16x16xi32>
      %73 = arith.subi %65, %72 : vector<16x16xi32>
      %c37_i32_14 = arith.constant 37 : i32
      %74 = vector.broadcast %c37_i32_14 : i32 to vector<16x16xi32>
      %75 = arith.subi %74, %65 : vector<16x16xi32>
      %76 = arith.select %71, %73, %75 : vector<16x16xi1>, vector<16x16xi32>
      %77 = arith.select %67, %69, %76 : vector<16x16xi1>, vector<16x16xi32>
      %78 = arith.cmpi eq, %77, %43 : vector<16x16xi32>
      %cst_15 = arith.constant 0.000000e+00 : f32
      %79 = vector.broadcast %15 : f32 to vector<16x16xf32>
      %80 = vector.broadcast %cst_15 : f32 to vector<16x16xf32>
      %81 = arith.select %78, %79, %80 : vector<16x16xi1>, vector<16x16xf32>
      %82 = arith.addf %63, %81 : vector<16x16xf32>
      %c2_i32 = arith.constant 2 : i32
      %83 = vector.broadcast %c2_i32 : i32 to vector<16x16xi32>
      %84 = arith.addi %42, %83 : vector<16x16xi32>
      %c7_i32_16 = arith.constant 7 : i32
      %85 = vector.broadcast %c7_i32_16 : i32 to vector<16x16xi32>
      %86 = arith.cmpi slt, %84, %85 : vector<16x16xi32>
      %c7_i32_17 = arith.constant 7 : i32
      %87 = vector.broadcast %c7_i32_17 : i32 to vector<16x16xi32>
      %88 = arith.subi %87, %84 : vector<16x16xi32>
      %c23_i32_18 = arith.constant 23 : i32
      %89 = vector.broadcast %c23_i32_18 : i32 to vector<16x16xi32>
      %90 = arith.cmpi slt, %84, %89 : vector<16x16xi32>
      %c7_i32_19 = arith.constant 7 : i32
      %91 = vector.broadcast %c7_i32_19 : i32 to vector<16x16xi32>
      %92 = arith.subi %84, %91 : vector<16x16xi32>
      %c37_i32_20 = arith.constant 37 : i32
      %93 = vector.broadcast %c37_i32_20 : i32 to vector<16x16xi32>
      %94 = arith.subi %93, %84 : vector<16x16xi32>
      %95 = arith.select %90, %92, %94 : vector<16x16xi1>, vector<16x16xi32>
      %96 = arith.select %86, %88, %95 : vector<16x16xi1>, vector<16x16xi32>
      %97 = arith.cmpi eq, %96, %43 : vector<16x16xi32>
      %cst_21 = arith.constant 0.000000e+00 : f32
      %98 = vector.broadcast %17 : f32 to vector<16x16xf32>
      %99 = vector.broadcast %cst_21 : f32 to vector<16x16xf32>
      %100 = arith.select %97, %98, %99 : vector<16x16xi1>, vector<16x16xf32>
      %101 = arith.addf %82, %100 : vector<16x16xf32>
      %c3_i32 = arith.constant 3 : i32
      %102 = vector.broadcast %c3_i32 : i32 to vector<16x16xi32>
      %103 = arith.addi %42, %102 : vector<16x16xi32>
      %c7_i32_22 = arith.constant 7 : i32
      %104 = vector.broadcast %c7_i32_22 : i32 to vector<16x16xi32>
      %105 = arith.cmpi slt, %103, %104 : vector<16x16xi32>
      %c7_i32_23 = arith.constant 7 : i32
      %106 = vector.broadcast %c7_i32_23 : i32 to vector<16x16xi32>
      %107 = arith.subi %106, %103 : vector<16x16xi32>
      %c23_i32_24 = arith.constant 23 : i32
      %108 = vector.broadcast %c23_i32_24 : i32 to vector<16x16xi32>
      %109 = arith.cmpi slt, %103, %108 : vector<16x16xi32>
      %c7_i32_25 = arith.constant 7 : i32
      %110 = vector.broadcast %c7_i32_25 : i32 to vector<16x16xi32>
      %111 = arith.subi %103, %110 : vector<16x16xi32>
      %c37_i32_26 = arith.constant 37 : i32
      %112 = vector.broadcast %c37_i32_26 : i32 to vector<16x16xi32>
      %113 = arith.subi %112, %103 : vector<16x16xi32>
      %114 = arith.select %109, %111, %113 : vector<16x16xi1>, vector<16x16xi32>
      %115 = arith.select %105, %107, %114 : vector<16x16xi1>, vector<16x16xi32>
      %116 = arith.cmpi eq, %115, %43 : vector<16x16xi32>
      %cst_27 = arith.constant 0.000000e+00 : f32
      %117 = vector.broadcast %19 : f32 to vector<16x16xf32>
      %118 = vector.broadcast %cst_27 : f32 to vector<16x16xf32>
      %119 = arith.select %116, %117, %118 : vector<16x16xi1>, vector<16x16xf32>
      %120 = arith.addf %101, %119 : vector<16x16xf32>
      %c4_i32 = arith.constant 4 : i32
      %121 = vector.broadcast %c4_i32 : i32 to vector<16x16xi32>
      %122 = arith.addi %42, %121 : vector<16x16xi32>
      %c7_i32_28 = arith.constant 7 : i32
      %123 = vector.broadcast %c7_i32_28 : i32 to vector<16x16xi32>
      %124 = arith.cmpi slt, %122, %123 : vector<16x16xi32>
      %c7_i32_29 = arith.constant 7 : i32
      %125 = vector.broadcast %c7_i32_29 : i32 to vector<16x16xi32>
      %126 = arith.subi %125, %122 : vector<16x16xi32>
      %c23_i32_30 = arith.constant 23 : i32
      %127 = vector.broadcast %c23_i32_30 : i32 to vector<16x16xi32>
      %128 = arith.cmpi slt, %122, %127 : vector<16x16xi32>
      %c7_i32_31 = arith.constant 7 : i32
      %129 = vector.broadcast %c7_i32_31 : i32 to vector<16x16xi32>
      %130 = arith.subi %122, %129 : vector<16x16xi32>
      %c37_i32_32 = arith.constant 37 : i32
      %131 = vector.broadcast %c37_i32_32 : i32 to vector<16x16xi32>
      %132 = arith.subi %131, %122 : vector<16x16xi32>
      %133 = arith.select %128, %130, %132 : vector<16x16xi1>, vector<16x16xi32>
      %134 = arith.select %124, %126, %133 : vector<16x16xi1>, vector<16x16xi32>
      %135 = arith.cmpi eq, %134, %43 : vector<16x16xi32>
      %cst_33 = arith.constant 0.000000e+00 : f32
      %136 = vector.broadcast %21 : f32 to vector<16x16xf32>
      %137 = vector.broadcast %cst_33 : f32 to vector<16x16xf32>
      %138 = arith.select %135, %136, %137 : vector<16x16xi1>, vector<16x16xf32>
      %139 = arith.addf %120, %138 : vector<16x16xf32>
      %c5_i32 = arith.constant 5 : i32
      %140 = vector.broadcast %c5_i32 : i32 to vector<16x16xi32>
      %141 = arith.addi %42, %140 : vector<16x16xi32>
      %c7_i32_34 = arith.constant 7 : i32
      %142 = vector.broadcast %c7_i32_34 : i32 to vector<16x16xi32>
      %143 = arith.cmpi slt, %141, %142 : vector<16x16xi32>
      %c7_i32_35 = arith.constant 7 : i32
      %144 = vector.broadcast %c7_i32_35 : i32 to vector<16x16xi32>
      %145 = arith.subi %144, %141 : vector<16x16xi32>
      %c23_i32_36 = arith.constant 23 : i32
      %146 = vector.broadcast %c23_i32_36 : i32 to vector<16x16xi32>
      %147 = arith.cmpi slt, %141, %146 : vector<16x16xi32>
      %c7_i32_37 = arith.constant 7 : i32
      %148 = vector.broadcast %c7_i32_37 : i32 to vector<16x16xi32>
      %149 = arith.subi %141, %148 : vector<16x16xi32>
      %c37_i32_38 = arith.constant 37 : i32
      %150 = vector.broadcast %c37_i32_38 : i32 to vector<16x16xi32>
      %151 = arith.subi %150, %141 : vector<16x16xi32>
      %152 = arith.select %147, %149, %151 : vector<16x16xi1>, vector<16x16xi32>
      %153 = arith.select %143, %145, %152 : vector<16x16xi1>, vector<16x16xi32>
      %154 = arith.cmpi eq, %153, %43 : vector<16x16xi32>
      %cst_39 = arith.constant 0.000000e+00 : f32
      %155 = vector.broadcast %23 : f32 to vector<16x16xf32>
      %156 = vector.broadcast %cst_39 : f32 to vector<16x16xf32>
      %157 = arith.select %154, %155, %156 : vector<16x16xi1>, vector<16x16xf32>
      %158 = arith.addf %139, %157 : vector<16x16xf32>
      %c6_i32 = arith.constant 6 : i32
      %159 = vector.broadcast %c6_i32 : i32 to vector<16x16xi32>
      %160 = arith.addi %42, %159 : vector<16x16xi32>
      %c7_i32_40 = arith.constant 7 : i32
      %161 = vector.broadcast %c7_i32_40 : i32 to vector<16x16xi32>
      %162 = arith.cmpi slt, %160, %161 : vector<16x16xi32>
      %c7_i32_41 = arith.constant 7 : i32
      %163 = vector.broadcast %c7_i32_41 : i32 to vector<16x16xi32>
      %164 = arith.subi %163, %160 : vector<16x16xi32>
      %c23_i32_42 = arith.constant 23 : i32
      %165 = vector.broadcast %c23_i32_42 : i32 to vector<16x16xi32>
      %166 = arith.cmpi slt, %160, %165 : vector<16x16xi32>
      %c7_i32_43 = arith.constant 7 : i32
      %167 = vector.broadcast %c7_i32_43 : i32 to vector<16x16xi32>
      %168 = arith.subi %160, %167 : vector<16x16xi32>
      %c37_i32_44 = arith.constant 37 : i32
      %169 = vector.broadcast %c37_i32_44 : i32 to vector<16x16xi32>
      %170 = arith.subi %169, %160 : vector<16x16xi32>
      %171 = arith.select %166, %168, %170 : vector<16x16xi1>, vector<16x16xi32>
      %172 = arith.select %162, %164, %171 : vector<16x16xi1>, vector<16x16xi32>
      %173 = arith.cmpi eq, %172, %43 : vector<16x16xi32>
      %cst_45 = arith.constant 0.000000e+00 : f32
      %174 = vector.broadcast %25 : f32 to vector<16x16xf32>
      %175 = vector.broadcast %cst_45 : f32 to vector<16x16xf32>
      %176 = arith.select %173, %174, %175 : vector<16x16xi1>, vector<16x16xf32>
      %177 = arith.addf %158, %176 : vector<16x16xf32>
      %c7_i32_46 = arith.constant 7 : i32
      %178 = vector.broadcast %c7_i32_46 : i32 to vector<16x16xi32>
      %179 = arith.addi %42, %178 : vector<16x16xi32>
      %c7_i32_47 = arith.constant 7 : i32
      %180 = vector.broadcast %c7_i32_47 : i32 to vector<16x16xi32>
      %181 = arith.cmpi slt, %179, %180 : vector<16x16xi32>
      %c7_i32_48 = arith.constant 7 : i32
      %182 = vector.broadcast %c7_i32_48 : i32 to vector<16x16xi32>
      %183 = arith.subi %182, %179 : vector<16x16xi32>
      %c23_i32_49 = arith.constant 23 : i32
      %184 = vector.broadcast %c23_i32_49 : i32 to vector<16x16xi32>
      %185 = arith.cmpi slt, %179, %184 : vector<16x16xi32>
      %c7_i32_50 = arith.constant 7 : i32
      %186 = vector.broadcast %c7_i32_50 : i32 to vector<16x16xi32>
      %187 = arith.subi %179, %186 : vector<16x16xi32>
      %c37_i32_51 = arith.constant 37 : i32
      %188 = vector.broadcast %c37_i32_51 : i32 to vector<16x16xi32>
      %189 = arith.subi %188, %179 : vector<16x16xi32>
      %190 = arith.select %185, %187, %189 : vector<16x16xi1>, vector<16x16xi32>
      %191 = arith.select %181, %183, %190 : vector<16x16xi1>, vector<16x16xi32>
      %192 = arith.cmpi eq, %191, %43 : vector<16x16xi32>
      %cst_52 = arith.constant 0.000000e+00 : f32
      %193 = vector.broadcast %27 : f32 to vector<16x16xf32>
      %194 = vector.broadcast %cst_52 : f32 to vector<16x16xf32>
      %195 = arith.select %192, %193, %194 : vector<16x16xi1>, vector<16x16xf32>
      %196 = arith.addf %177, %195 : vector<16x16xf32>
      %c8_i32 = arith.constant 8 : i32
      %197 = vector.broadcast %c8_i32 : i32 to vector<16x16xi32>
      %198 = arith.addi %42, %197 : vector<16x16xi32>
      %c7_i32_53 = arith.constant 7 : i32
      %199 = vector.broadcast %c7_i32_53 : i32 to vector<16x16xi32>
      %200 = arith.cmpi slt, %198, %199 : vector<16x16xi32>
      %c7_i32_54 = arith.constant 7 : i32
      %201 = vector.broadcast %c7_i32_54 : i32 to vector<16x16xi32>
      %202 = arith.subi %201, %198 : vector<16x16xi32>
      %c23_i32_55 = arith.constant 23 : i32
      %203 = vector.broadcast %c23_i32_55 : i32 to vector<16x16xi32>
      %204 = arith.cmpi slt, %198, %203 : vector<16x16xi32>
      %c7_i32_56 = arith.constant 7 : i32
      %205 = vector.broadcast %c7_i32_56 : i32 to vector<16x16xi32>
      %206 = arith.subi %198, %205 : vector<16x16xi32>
      %c37_i32_57 = arith.constant 37 : i32
      %207 = vector.broadcast %c37_i32_57 : i32 to vector<16x16xi32>
      %208 = arith.subi %207, %198 : vector<16x16xi32>
      %209 = arith.select %204, %206, %208 : vector<16x16xi1>, vector<16x16xi32>
      %210 = arith.select %200, %202, %209 : vector<16x16xi1>, vector<16x16xi32>
      %211 = arith.cmpi eq, %210, %43 : vector<16x16xi32>
      %cst_58 = arith.constant 0.000000e+00 : f32
      %212 = vector.broadcast %29 : f32 to vector<16x16xf32>
      %213 = vector.broadcast %cst_58 : f32 to vector<16x16xf32>
      %214 = arith.select %211, %212, %213 : vector<16x16xi1>, vector<16x16xf32>
      %215 = arith.addf %196, %214 : vector<16x16xf32>
      %c9_i32 = arith.constant 9 : i32
      %216 = vector.broadcast %c9_i32 : i32 to vector<16x16xi32>
      %217 = arith.addi %42, %216 : vector<16x16xi32>
      %c7_i32_59 = arith.constant 7 : i32
      %218 = vector.broadcast %c7_i32_59 : i32 to vector<16x16xi32>
      %219 = arith.cmpi slt, %217, %218 : vector<16x16xi32>
      %c7_i32_60 = arith.constant 7 : i32
      %220 = vector.broadcast %c7_i32_60 : i32 to vector<16x16xi32>
      %221 = arith.subi %220, %217 : vector<16x16xi32>
      %c23_i32_61 = arith.constant 23 : i32
      %222 = vector.broadcast %c23_i32_61 : i32 to vector<16x16xi32>
      %223 = arith.cmpi slt, %217, %222 : vector<16x16xi32>
      %c7_i32_62 = arith.constant 7 : i32
      %224 = vector.broadcast %c7_i32_62 : i32 to vector<16x16xi32>
      %225 = arith.subi %217, %224 : vector<16x16xi32>
      %c37_i32_63 = arith.constant 37 : i32
      %226 = vector.broadcast %c37_i32_63 : i32 to vector<16x16xi32>
      %227 = arith.subi %226, %217 : vector<16x16xi32>
      %228 = arith.select %223, %225, %227 : vector<16x16xi1>, vector<16x16xi32>
      %229 = arith.select %219, %221, %228 : vector<16x16xi1>, vector<16x16xi32>
      %230 = arith.cmpi eq, %229, %43 : vector<16x16xi32>
      %cst_64 = arith.constant 0.000000e+00 : f32
      %231 = vector.broadcast %31 : f32 to vector<16x16xf32>
      %232 = vector.broadcast %cst_64 : f32 to vector<16x16xf32>
      %233 = arith.select %230, %231, %232 : vector<16x16xi1>, vector<16x16xf32>
      %234 = arith.addf %215, %233 : vector<16x16xf32>
      %c10_i32 = arith.constant 10 : i32
      %235 = vector.broadcast %c10_i32 : i32 to vector<16x16xi32>
      %236 = arith.addi %42, %235 : vector<16x16xi32>
      %c7_i32_65 = arith.constant 7 : i32
      %237 = vector.broadcast %c7_i32_65 : i32 to vector<16x16xi32>
      %238 = arith.cmpi slt, %236, %237 : vector<16x16xi32>
      %c7_i32_66 = arith.constant 7 : i32
      %239 = vector.broadcast %c7_i32_66 : i32 to vector<16x16xi32>
      %240 = arith.subi %239, %236 : vector<16x16xi32>
      %c23_i32_67 = arith.constant 23 : i32
      %241 = vector.broadcast %c23_i32_67 : i32 to vector<16x16xi32>
      %242 = arith.cmpi slt, %236, %241 : vector<16x16xi32>
      %c7_i32_68 = arith.constant 7 : i32
      %243 = vector.broadcast %c7_i32_68 : i32 to vector<16x16xi32>
      %244 = arith.subi %236, %243 : vector<16x16xi32>
      %c37_i32_69 = arith.constant 37 : i32
      %245 = vector.broadcast %c37_i32_69 : i32 to vector<16x16xi32>
      %246 = arith.subi %245, %236 : vector<16x16xi32>
      %247 = arith.select %242, %244, %246 : vector<16x16xi1>, vector<16x16xi32>
      %248 = arith.select %238, %240, %247 : vector<16x16xi1>, vector<16x16xi32>
      %249 = arith.cmpi eq, %248, %43 : vector<16x16xi32>
      %cst_70 = arith.constant 0.000000e+00 : f32
      %250 = vector.broadcast %33 : f32 to vector<16x16xf32>
      %251 = vector.broadcast %cst_70 : f32 to vector<16x16xf32>
      %252 = arith.select %249, %250, %251 : vector<16x16xi1>, vector<16x16xf32>
      %253 = arith.addf %234, %252 : vector<16x16xf32>
      %c11_i32 = arith.constant 11 : i32
      %254 = vector.broadcast %c11_i32 : i32 to vector<16x16xi32>
      %255 = arith.addi %42, %254 : vector<16x16xi32>
      %c7_i32_71 = arith.constant 7 : i32
      %256 = vector.broadcast %c7_i32_71 : i32 to vector<16x16xi32>
      %257 = arith.cmpi slt, %255, %256 : vector<16x16xi32>
      %c7_i32_72 = arith.constant 7 : i32
      %258 = vector.broadcast %c7_i32_72 : i32 to vector<16x16xi32>
      %259 = arith.subi %258, %255 : vector<16x16xi32>
      %c23_i32_73 = arith.constant 23 : i32
      %260 = vector.broadcast %c23_i32_73 : i32 to vector<16x16xi32>
      %261 = arith.cmpi slt, %255, %260 : vector<16x16xi32>
      %c7_i32_74 = arith.constant 7 : i32
      %262 = vector.broadcast %c7_i32_74 : i32 to vector<16x16xi32>
      %263 = arith.subi %255, %262 : vector<16x16xi32>
      %c37_i32_75 = arith.constant 37 : i32
      %264 = vector.broadcast %c37_i32_75 : i32 to vector<16x16xi32>
      %265 = arith.subi %264, %255 : vector<16x16xi32>
      %266 = arith.select %261, %263, %265 : vector<16x16xi1>, vector<16x16xi32>
      %267 = arith.select %257, %259, %266 : vector<16x16xi1>, vector<16x16xi32>
      %268 = arith.cmpi eq, %267, %43 : vector<16x16xi32>
      %cst_76 = arith.constant 0.000000e+00 : f32
      %269 = vector.broadcast %35 : f32 to vector<16x16xf32>
      %270 = vector.broadcast %cst_76 : f32 to vector<16x16xf32>
      %271 = arith.select %268, %269, %270 : vector<16x16xi1>, vector<16x16xf32>
      %272 = arith.addf %253, %271 : vector<16x16xf32>
      %c12_i32 = arith.constant 12 : i32
      %273 = vector.broadcast %c12_i32 : i32 to vector<16x16xi32>
      %274 = arith.addi %42, %273 : vector<16x16xi32>
      %c7_i32_77 = arith.constant 7 : i32
      %275 = vector.broadcast %c7_i32_77 : i32 to vector<16x16xi32>
      %276 = arith.cmpi slt, %274, %275 : vector<16x16xi32>
      %c7_i32_78 = arith.constant 7 : i32
      %277 = vector.broadcast %c7_i32_78 : i32 to vector<16x16xi32>
      %278 = arith.subi %277, %274 : vector<16x16xi32>
      %c23_i32_79 = arith.constant 23 : i32
      %279 = vector.broadcast %c23_i32_79 : i32 to vector<16x16xi32>
      %280 = arith.cmpi slt, %274, %279 : vector<16x16xi32>
      %c7_i32_80 = arith.constant 7 : i32
      %281 = vector.broadcast %c7_i32_80 : i32 to vector<16x16xi32>
      %282 = arith.subi %274, %281 : vector<16x16xi32>
      %c37_i32_81 = arith.constant 37 : i32
      %283 = vector.broadcast %c37_i32_81 : i32 to vector<16x16xi32>
      %284 = arith.subi %283, %274 : vector<16x16xi32>
      %285 = arith.select %280, %282, %284 : vector<16x16xi1>, vector<16x16xi32>
      %286 = arith.select %276, %278, %285 : vector<16x16xi1>, vector<16x16xi32>
      %287 = arith.cmpi eq, %286, %43 : vector<16x16xi32>
      %cst_82 = arith.constant 0.000000e+00 : f32
      %288 = vector.broadcast %37 : f32 to vector<16x16xf32>
      %289 = vector.broadcast %cst_82 : f32 to vector<16x16xf32>
      %290 = arith.select %287, %288, %289 : vector<16x16xi1>, vector<16x16xf32>
      %291 = arith.addf %272, %290 : vector<16x16xf32>
      %c13_i32 = arith.constant 13 : i32
      %292 = vector.broadcast %c13_i32 : i32 to vector<16x16xi32>
      %293 = arith.addi %42, %292 : vector<16x16xi32>
      %c7_i32_83 = arith.constant 7 : i32
      %294 = vector.broadcast %c7_i32_83 : i32 to vector<16x16xi32>
      %295 = arith.cmpi slt, %293, %294 : vector<16x16xi32>
      %c7_i32_84 = arith.constant 7 : i32
      %296 = vector.broadcast %c7_i32_84 : i32 to vector<16x16xi32>
      %297 = arith.subi %296, %293 : vector<16x16xi32>
      %c23_i32_85 = arith.constant 23 : i32
      %298 = vector.broadcast %c23_i32_85 : i32 to vector<16x16xi32>
      %299 = arith.cmpi slt, %293, %298 : vector<16x16xi32>
      %c7_i32_86 = arith.constant 7 : i32
      %300 = vector.broadcast %c7_i32_86 : i32 to vector<16x16xi32>
      %301 = arith.subi %293, %300 : vector<16x16xi32>
      %c37_i32_87 = arith.constant 37 : i32
      %302 = vector.broadcast %c37_i32_87 : i32 to vector<16x16xi32>
      %303 = arith.subi %302, %293 : vector<16x16xi32>
      %304 = arith.select %299, %301, %303 : vector<16x16xi1>, vector<16x16xi32>
      %305 = arith.select %295, %297, %304 : vector<16x16xi1>, vector<16x16xi32>
      %306 = arith.cmpi eq, %305, %43 : vector<16x16xi32>
      %cst_88 = arith.constant 0.000000e+00 : f32
      %307 = vector.broadcast %39 : f32 to vector<16x16xf32>
      %308 = vector.broadcast %cst_88 : f32 to vector<16x16xf32>
      %309 = arith.select %306, %307, %308 : vector<16x16xi1>, vector<16x16xf32>
      %310 = arith.addf %291, %309 : vector<16x16xf32>
      %c14_i32 = arith.constant 14 : i32
      %311 = vector.broadcast %c14_i32 : i32 to vector<16x16xi32>
      %312 = arith.addi %42, %311 : vector<16x16xi32>
      %c7_i32_89 = arith.constant 7 : i32
      %313 = vector.broadcast %c7_i32_89 : i32 to vector<16x16xi32>
      %314 = arith.cmpi slt, %312, %313 : vector<16x16xi32>
      %c7_i32_90 = arith.constant 7 : i32
      %315 = vector.broadcast %c7_i32_90 : i32 to vector<16x16xi32>
      %316 = arith.subi %315, %312 : vector<16x16xi32>
      %c23_i32_91 = arith.constant 23 : i32
      %317 = vector.broadcast %c23_i32_91 : i32 to vector<16x16xi32>
      %318 = arith.cmpi slt, %312, %317 : vector<16x16xi32>
      %c7_i32_92 = arith.constant 7 : i32
      %319 = vector.broadcast %c7_i32_92 : i32 to vector<16x16xi32>
      %320 = arith.subi %312, %319 : vector<16x16xi32>
      %c37_i32_93 = arith.constant 37 : i32
      %321 = vector.broadcast %c37_i32_93 : i32 to vector<16x16xi32>
      %322 = arith.subi %321, %312 : vector<16x16xi32>
      %323 = arith.select %318, %320, %322 : vector<16x16xi1>, vector<16x16xi32>
      %324 = arith.select %314, %316, %323 : vector<16x16xi1>, vector<16x16xi32>
      %325 = arith.cmpi eq, %324, %43 : vector<16x16xi32>
      %cst_94 = arith.constant 0.000000e+00 : f32
      %326 = vector.broadcast %41 : f32 to vector<16x16xf32>
      %327 = vector.broadcast %cst_94 : f32 to vector<16x16xf32>
      %328 = arith.select %325, %326, %327 : vector<16x16xi1>, vector<16x16xf32>
      %329 = arith.addf %310, %328 : vector<16x16xf32>
      %330 = tpu.iota {dimensions = array<i32: 1>} : vector<16x16xi32>
      %331 = tpu.iota {dimensions = array<i32: 0>} : vector<16x16xi32>
      %cst_95 = arith.constant 0.000000e+00 : f32
      %332 = vector.broadcast %cst_95 : f32 to vector<16x16xf32>
      %c0_i32_96 = arith.constant 0 : i32
      %333 = vector.broadcast %c0_i32_96 : i32 to vector<16x16xi32>
      %334 = arith.addi %330, %333 : vector<16x16xi32>
      %c7_i32_97 = arith.constant 7 : i32
      %335 = vector.broadcast %c7_i32_97 : i32 to vector<16x16xi32>
      %336 = arith.cmpi slt, %334, %335 : vector<16x16xi32>
      %c7_i32_98 = arith.constant 7 : i32
      %337 = vector.broadcast %c7_i32_98 : i32 to vector<16x16xi32>
      %338 = arith.subi %337, %334 : vector<16x16xi32>
      %c23_i32_99 = arith.constant 23 : i32
      %339 = vector.broadcast %c23_i32_99 : i32 to vector<16x16xi32>
      %340 = arith.cmpi slt, %334, %339 : vector<16x16xi32>
      %c7_i32_100 = arith.constant 7 : i32
      %341 = vector.broadcast %c7_i32_100 : i32 to vector<16x16xi32>
      %342 = arith.subi %334, %341 : vector<16x16xi32>
      %c37_i32_101 = arith.constant 37 : i32
      %343 = vector.broadcast %c37_i32_101 : i32 to vector<16x16xi32>
      %344 = arith.subi %343, %334 : vector<16x16xi32>
      %345 = arith.select %340, %342, %344 : vector<16x16xi1>, vector<16x16xi32>
      %346 = arith.select %336, %338, %345 : vector<16x16xi1>, vector<16x16xi32>
      %347 = arith.cmpi eq, %346, %331 : vector<16x16xi32>
      %cst_102 = arith.constant 0.000000e+00 : f32
      %348 = vector.broadcast %13 : f32 to vector<16x16xf32>
      %349 = vector.broadcast %cst_102 : f32 to vector<16x16xf32>
      %350 = arith.select %347, %348, %349 : vector<16x16xi1>, vector<16x16xf32>
      %351 = arith.addf %332, %350 : vector<16x16xf32>
      %c1_i32_103 = arith.constant 1 : i32
      %352 = vector.broadcast %c1_i32_103 : i32 to vector<16x16xi32>
      %353 = arith.addi %330, %352 : vector<16x16xi32>
      %c7_i32_104 = arith.constant 7 : i32
      %354 = vector.broadcast %c7_i32_104 : i32 to vector<16x16xi32>
      %355 = arith.cmpi slt, %353, %354 : vector<16x16xi32>
      %c7_i32_105 = arith.constant 7 : i32
      %356 = vector.broadcast %c7_i32_105 : i32 to vector<16x16xi32>
      %357 = arith.subi %356, %353 : vector<16x16xi32>
      %c23_i32_106 = arith.constant 23 : i32
      %358 = vector.broadcast %c23_i32_106 : i32 to vector<16x16xi32>
      %359 = arith.cmpi slt, %353, %358 : vector<16x16xi32>
      %c7_i32_107 = arith.constant 7 : i32
      %360 = vector.broadcast %c7_i32_107 : i32 to vector<16x16xi32>
      %361 = arith.subi %353, %360 : vector<16x16xi32>
      %c37_i32_108 = arith.constant 37 : i32
      %362 = vector.broadcast %c37_i32_108 : i32 to vector<16x16xi32>
      %363 = arith.subi %362, %353 : vector<16x16xi32>
      %364 = arith.select %359, %361, %363 : vector<16x16xi1>, vector<16x16xi32>
      %365 = arith.select %355, %357, %364 : vector<16x16xi1>, vector<16x16xi32>
      %366 = arith.cmpi eq, %365, %331 : vector<16x16xi32>
      %cst_109 = arith.constant 0.000000e+00 : f32
      %367 = vector.broadcast %15 : f32 to vector<16x16xf32>
      %368 = vector.broadcast %cst_109 : f32 to vector<16x16xf32>
      %369 = arith.select %366, %367, %368 : vector<16x16xi1>, vector<16x16xf32>
      %370 = arith.addf %351, %369 : vector<16x16xf32>
      %c2_i32_110 = arith.constant 2 : i32
      %371 = vector.broadcast %c2_i32_110 : i32 to vector<16x16xi32>
      %372 = arith.addi %330, %371 : vector<16x16xi32>
      %c7_i32_111 = arith.constant 7 : i32
      %373 = vector.broadcast %c7_i32_111 : i32 to vector<16x16xi32>
      %374 = arith.cmpi slt, %372, %373 : vector<16x16xi32>
      %c7_i32_112 = arith.constant 7 : i32
      %375 = vector.broadcast %c7_i32_112 : i32 to vector<16x16xi32>
      %376 = arith.subi %375, %372 : vector<16x16xi32>
      %c23_i32_113 = arith.constant 23 : i32
      %377 = vector.broadcast %c23_i32_113 : i32 to vector<16x16xi32>
      %378 = arith.cmpi slt, %372, %377 : vector<16x16xi32>
      %c7_i32_114 = arith.constant 7 : i32
      %379 = vector.broadcast %c7_i32_114 : i32 to vector<16x16xi32>
      %380 = arith.subi %372, %379 : vector<16x16xi32>
      %c37_i32_115 = arith.constant 37 : i32
      %381 = vector.broadcast %c37_i32_115 : i32 to vector<16x16xi32>
      %382 = arith.subi %381, %372 : vector<16x16xi32>
      %383 = arith.select %378, %380, %382 : vector<16x16xi1>, vector<16x16xi32>
      %384 = arith.select %374, %376, %383 : vector<16x16xi1>, vector<16x16xi32>
      %385 = arith.cmpi eq, %384, %331 : vector<16x16xi32>
      %cst_116 = arith.constant 0.000000e+00 : f32
      %386 = vector.broadcast %17 : f32 to vector<16x16xf32>
      %387 = vector.broadcast %cst_116 : f32 to vector<16x16xf32>
      %388 = arith.select %385, %386, %387 : vector<16x16xi1>, vector<16x16xf32>
      %389 = arith.addf %370, %388 : vector<16x16xf32>
      %c3_i32_117 = arith.constant 3 : i32
      %390 = vector.broadcast %c3_i32_117 : i32 to vector<16x16xi32>
      %391 = arith.addi %330, %390 : vector<16x16xi32>
      %c7_i32_118 = arith.constant 7 : i32
      %392 = vector.broadcast %c7_i32_118 : i32 to vector<16x16xi32>
      %393 = arith.cmpi slt, %391, %392 : vector<16x16xi32>
      %c7_i32_119 = arith.constant 7 : i32
      %394 = vector.broadcast %c7_i32_119 : i32 to vector<16x16xi32>
      %395 = arith.subi %394, %391 : vector<16x16xi32>
      %c23_i32_120 = arith.constant 23 : i32
      %396 = vector.broadcast %c23_i32_120 : i32 to vector<16x16xi32>
      %397 = arith.cmpi slt, %391, %396 : vector<16x16xi32>
      %c7_i32_121 = arith.constant 7 : i32
      %398 = vector.broadcast %c7_i32_121 : i32 to vector<16x16xi32>
      %399 = arith.subi %391, %398 : vector<16x16xi32>
      %c37_i32_122 = arith.constant 37 : i32
      %400 = vector.broadcast %c37_i32_122 : i32 to vector<16x16xi32>
      %401 = arith.subi %400, %391 : vector<16x16xi32>
      %402 = arith.select %397, %399, %401 : vector<16x16xi1>, vector<16x16xi32>
      %403 = arith.select %393, %395, %402 : vector<16x16xi1>, vector<16x16xi32>
      %404 = arith.cmpi eq, %403, %331 : vector<16x16xi32>
      %cst_123 = arith.constant 0.000000e+00 : f32
      %405 = vector.broadcast %19 : f32 to vector<16x16xf32>
      %406 = vector.broadcast %cst_123 : f32 to vector<16x16xf32>
      %407 = arith.select %404, %405, %406 : vector<16x16xi1>, vector<16x16xf32>
      %408 = arith.addf %389, %407 : vector<16x16xf32>
      %c4_i32_124 = arith.constant 4 : i32
      %409 = vector.broadcast %c4_i32_124 : i32 to vector<16x16xi32>
      %410 = arith.addi %330, %409 : vector<16x16xi32>
      %c7_i32_125 = arith.constant 7 : i32
      %411 = vector.broadcast %c7_i32_125 : i32 to vector<16x16xi32>
      %412 = arith.cmpi slt, %410, %411 : vector<16x16xi32>
      %c7_i32_126 = arith.constant 7 : i32
      %413 = vector.broadcast %c7_i32_126 : i32 to vector<16x16xi32>
      %414 = arith.subi %413, %410 : vector<16x16xi32>
      %c23_i32_127 = arith.constant 23 : i32
      %415 = vector.broadcast %c23_i32_127 : i32 to vector<16x16xi32>
      %416 = arith.cmpi slt, %410, %415 : vector<16x16xi32>
      %c7_i32_128 = arith.constant 7 : i32
      %417 = vector.broadcast %c7_i32_128 : i32 to vector<16x16xi32>
      %418 = arith.subi %410, %417 : vector<16x16xi32>
      %c37_i32_129 = arith.constant 37 : i32
      %419 = vector.broadcast %c37_i32_129 : i32 to vector<16x16xi32>
      %420 = arith.subi %419, %410 : vector<16x16xi32>
      %421 = arith.select %416, %418, %420 : vector<16x16xi1>, vector<16x16xi32>
      %422 = arith.select %412, %414, %421 : vector<16x16xi1>, vector<16x16xi32>
      %423 = arith.cmpi eq, %422, %331 : vector<16x16xi32>
      %cst_130 = arith.constant 0.000000e+00 : f32
      %424 = vector.broadcast %21 : f32 to vector<16x16xf32>
      %425 = vector.broadcast %cst_130 : f32 to vector<16x16xf32>
      %426 = arith.select %423, %424, %425 : vector<16x16xi1>, vector<16x16xf32>
      %427 = arith.addf %408, %426 : vector<16x16xf32>
      %c5_i32_131 = arith.constant 5 : i32
      %428 = vector.broadcast %c5_i32_131 : i32 to vector<16x16xi32>
      %429 = arith.addi %330, %428 : vector<16x16xi32>
      %c7_i32_132 = arith.constant 7 : i32
      %430 = vector.broadcast %c7_i32_132 : i32 to vector<16x16xi32>
      %431 = arith.cmpi slt, %429, %430 : vector<16x16xi32>
      %c7_i32_133 = arith.constant 7 : i32
      %432 = vector.broadcast %c7_i32_133 : i32 to vector<16x16xi32>
      %433 = arith.subi %432, %429 : vector<16x16xi32>
      %c23_i32_134 = arith.constant 23 : i32
      %434 = vector.broadcast %c23_i32_134 : i32 to vector<16x16xi32>
      %435 = arith.cmpi slt, %429, %434 : vector<16x16xi32>
      %c7_i32_135 = arith.constant 7 : i32
      %436 = vector.broadcast %c7_i32_135 : i32 to vector<16x16xi32>
      %437 = arith.subi %429, %436 : vector<16x16xi32>
      %c37_i32_136 = arith.constant 37 : i32
      %438 = vector.broadcast %c37_i32_136 : i32 to vector<16x16xi32>
      %439 = arith.subi %438, %429 : vector<16x16xi32>
      %440 = arith.select %435, %437, %439 : vector<16x16xi1>, vector<16x16xi32>
      %441 = arith.select %431, %433, %440 : vector<16x16xi1>, vector<16x16xi32>
      %442 = arith.cmpi eq, %441, %331 : vector<16x16xi32>
      %cst_137 = arith.constant 0.000000e+00 : f32
      %443 = vector.broadcast %23 : f32 to vector<16x16xf32>
      %444 = vector.broadcast %cst_137 : f32 to vector<16x16xf32>
      %445 = arith.select %442, %443, %444 : vector<16x16xi1>, vector<16x16xf32>
      %446 = arith.addf %427, %445 : vector<16x16xf32>
      %c6_i32_138 = arith.constant 6 : i32
      %447 = vector.broadcast %c6_i32_138 : i32 to vector<16x16xi32>
      %448 = arith.addi %330, %447 : vector<16x16xi32>
      %c7_i32_139 = arith.constant 7 : i32
      %449 = vector.broadcast %c7_i32_139 : i32 to vector<16x16xi32>
      %450 = arith.cmpi slt, %448, %449 : vector<16x16xi32>
      %c7_i32_140 = arith.constant 7 : i32
      %451 = vector.broadcast %c7_i32_140 : i32 to vector<16x16xi32>
      %452 = arith.subi %451, %448 : vector<16x16xi32>
      %c23_i32_141 = arith.constant 23 : i32
      %453 = vector.broadcast %c23_i32_141 : i32 to vector<16x16xi32>
      %454 = arith.cmpi slt, %448, %453 : vector<16x16xi32>
      %c7_i32_142 = arith.constant 7 : i32
      %455 = vector.broadcast %c7_i32_142 : i32 to vector<16x16xi32>
      %456 = arith.subi %448, %455 : vector<16x16xi32>
      %c37_i32_143 = arith.constant 37 : i32
      %457 = vector.broadcast %c37_i32_143 : i32 to vector<16x16xi32>
      %458 = arith.subi %457, %448 : vector<16x16xi32>
      %459 = arith.select %454, %456, %458 : vector<16x16xi1>, vector<16x16xi32>
      %460 = arith.select %450, %452, %459 : vector<16x16xi1>, vector<16x16xi32>
      %461 = arith.cmpi eq, %460, %331 : vector<16x16xi32>
      %cst_144 = arith.constant 0.000000e+00 : f32
      %462 = vector.broadcast %25 : f32 to vector<16x16xf32>
      %463 = vector.broadcast %cst_144 : f32 to vector<16x16xf32>
      %464 = arith.select %461, %462, %463 : vector<16x16xi1>, vector<16x16xf32>
      %465 = arith.addf %446, %464 : vector<16x16xf32>
      %c7_i32_145 = arith.constant 7 : i32
      %466 = vector.broadcast %c7_i32_145 : i32 to vector<16x16xi32>
      %467 = arith.addi %330, %466 : vector<16x16xi32>
      %c7_i32_146 = arith.constant 7 : i32
      %468 = vector.broadcast %c7_i32_146 : i32 to vector<16x16xi32>
      %469 = arith.cmpi slt, %467, %468 : vector<16x16xi32>
      %c7_i32_147 = arith.constant 7 : i32
      %470 = vector.broadcast %c7_i32_147 : i32 to vector<16x16xi32>
      %471 = arith.subi %470, %467 : vector<16x16xi32>
      %c23_i32_148 = arith.constant 23 : i32
      %472 = vector.broadcast %c23_i32_148 : i32 to vector<16x16xi32>
      %473 = arith.cmpi slt, %467, %472 : vector<16x16xi32>
      %c7_i32_149 = arith.constant 7 : i32
      %474 = vector.broadcast %c7_i32_149 : i32 to vector<16x16xi32>
      %475 = arith.subi %467, %474 : vector<16x16xi32>
      %c37_i32_150 = arith.constant 37 : i32
      %476 = vector.broadcast %c37_i32_150 : i32 to vector<16x16xi32>
      %477 = arith.subi %476, %467 : vector<16x16xi32>
      %478 = arith.select %473, %475, %477 : vector<16x16xi1>, vector<16x16xi32>
      %479 = arith.select %469, %471, %478 : vector<16x16xi1>, vector<16x16xi32>
      %480 = arith.cmpi eq, %479, %331 : vector<16x16xi32>
      %cst_151 = arith.constant 0.000000e+00 : f32
      %481 = vector.broadcast %27 : f32 to vector<16x16xf32>
      %482 = vector.broadcast %cst_151 : f32 to vector<16x16xf32>
      %483 = arith.select %480, %481, %482 : vector<16x16xi1>, vector<16x16xf32>
      %484 = arith.addf %465, %483 : vector<16x16xf32>
      %c8_i32_152 = arith.constant 8 : i32
      %485 = vector.broadcast %c8_i32_152 : i32 to vector<16x16xi32>
      %486 = arith.addi %330, %485 : vector<16x16xi32>
      %c7_i32_153 = arith.constant 7 : i32
      %487 = vector.broadcast %c7_i32_153 : i32 to vector<16x16xi32>
      %488 = arith.cmpi slt, %486, %487 : vector<16x16xi32>
      %c7_i32_154 = arith.constant 7 : i32
      %489 = vector.broadcast %c7_i32_154 : i32 to vector<16x16xi32>
      %490 = arith.subi %489, %486 : vector<16x16xi32>
      %c23_i32_155 = arith.constant 23 : i32
      %491 = vector.broadcast %c23_i32_155 : i32 to vector<16x16xi32>
      %492 = arith.cmpi slt, %486, %491 : vector<16x16xi32>
      %c7_i32_156 = arith.constant 7 : i32
      %493 = vector.broadcast %c7_i32_156 : i32 to vector<16x16xi32>
      %494 = arith.subi %486, %493 : vector<16x16xi32>
      %c37_i32_157 = arith.constant 37 : i32
      %495 = vector.broadcast %c37_i32_157 : i32 to vector<16x16xi32>
      %496 = arith.subi %495, %486 : vector<16x16xi32>
      %497 = arith.select %492, %494, %496 : vector<16x16xi1>, vector<16x16xi32>
      %498 = arith.select %488, %490, %497 : vector<16x16xi1>, vector<16x16xi32>
      %499 = arith.cmpi eq, %498, %331 : vector<16x16xi32>
      %cst_158 = arith.constant 0.000000e+00 : f32
      %500 = vector.broadcast %29 : f32 to vector<16x16xf32>
      %501 = vector.broadcast %cst_158 : f32 to vector<16x16xf32>
      %502 = arith.select %499, %500, %501 : vector<16x16xi1>, vector<16x16xf32>
      %503 = arith.addf %484, %502 : vector<16x16xf32>
      %c9_i32_159 = arith.constant 9 : i32
      %504 = vector.broadcast %c9_i32_159 : i32 to vector<16x16xi32>
      %505 = arith.addi %330, %504 : vector<16x16xi32>
      %c7_i32_160 = arith.constant 7 : i32
      %506 = vector.broadcast %c7_i32_160 : i32 to vector<16x16xi32>
      %507 = arith.cmpi slt, %505, %506 : vector<16x16xi32>
      %c7_i32_161 = arith.constant 7 : i32
      %508 = vector.broadcast %c7_i32_161 : i32 to vector<16x16xi32>
      %509 = arith.subi %508, %505 : vector<16x16xi32>
      %c23_i32_162 = arith.constant 23 : i32
      %510 = vector.broadcast %c23_i32_162 : i32 to vector<16x16xi32>
      %511 = arith.cmpi slt, %505, %510 : vector<16x16xi32>
      %c7_i32_163 = arith.constant 7 : i32
      %512 = vector.broadcast %c7_i32_163 : i32 to vector<16x16xi32>
      %513 = arith.subi %505, %512 : vector<16x16xi32>
      %c37_i32_164 = arith.constant 37 : i32
      %514 = vector.broadcast %c37_i32_164 : i32 to vector<16x16xi32>
      %515 = arith.subi %514, %505 : vector<16x16xi32>
      %516 = arith.select %511, %513, %515 : vector<16x16xi1>, vector<16x16xi32>
      %517 = arith.select %507, %509, %516 : vector<16x16xi1>, vector<16x16xi32>
      %518 = arith.cmpi eq, %517, %331 : vector<16x16xi32>
      %cst_165 = arith.constant 0.000000e+00 : f32
      %519 = vector.broadcast %31 : f32 to vector<16x16xf32>
      %520 = vector.broadcast %cst_165 : f32 to vector<16x16xf32>
      %521 = arith.select %518, %519, %520 : vector<16x16xi1>, vector<16x16xf32>
      %522 = arith.addf %503, %521 : vector<16x16xf32>
      %c10_i32_166 = arith.constant 10 : i32
      %523 = vector.broadcast %c10_i32_166 : i32 to vector<16x16xi32>
      %524 = arith.addi %330, %523 : vector<16x16xi32>
      %c7_i32_167 = arith.constant 7 : i32
      %525 = vector.broadcast %c7_i32_167 : i32 to vector<16x16xi32>
      %526 = arith.cmpi slt, %524, %525 : vector<16x16xi32>
      %c7_i32_168 = arith.constant 7 : i32
      %527 = vector.broadcast %c7_i32_168 : i32 to vector<16x16xi32>
      %528 = arith.subi %527, %524 : vector<16x16xi32>
      %c23_i32_169 = arith.constant 23 : i32
      %529 = vector.broadcast %c23_i32_169 : i32 to vector<16x16xi32>
      %530 = arith.cmpi slt, %524, %529 : vector<16x16xi32>
      %c7_i32_170 = arith.constant 7 : i32
      %531 = vector.broadcast %c7_i32_170 : i32 to vector<16x16xi32>
      %532 = arith.subi %524, %531 : vector<16x16xi32>
      %c37_i32_171 = arith.constant 37 : i32
      %533 = vector.broadcast %c37_i32_171 : i32 to vector<16x16xi32>
      %534 = arith.subi %533, %524 : vector<16x16xi32>
      %535 = arith.select %530, %532, %534 : vector<16x16xi1>, vector<16x16xi32>
      %536 = arith.select %526, %528, %535 : vector<16x16xi1>, vector<16x16xi32>
      %537 = arith.cmpi eq, %536, %331 : vector<16x16xi32>
      %cst_172 = arith.constant 0.000000e+00 : f32
      %538 = vector.broadcast %33 : f32 to vector<16x16xf32>
      %539 = vector.broadcast %cst_172 : f32 to vector<16x16xf32>
      %540 = arith.select %537, %538, %539 : vector<16x16xi1>, vector<16x16xf32>
      %541 = arith.addf %522, %540 : vector<16x16xf32>
      %c11_i32_173 = arith.constant 11 : i32
      %542 = vector.broadcast %c11_i32_173 : i32 to vector<16x16xi32>
      %543 = arith.addi %330, %542 : vector<16x16xi32>
      %c7_i32_174 = arith.constant 7 : i32
      %544 = vector.broadcast %c7_i32_174 : i32 to vector<16x16xi32>
      %545 = arith.cmpi slt, %543, %544 : vector<16x16xi32>
      %c7_i32_175 = arith.constant 7 : i32
      %546 = vector.broadcast %c7_i32_175 : i32 to vector<16x16xi32>
      %547 = arith.subi %546, %543 : vector<16x16xi32>
      %c23_i32_176 = arith.constant 23 : i32
      %548 = vector.broadcast %c23_i32_176 : i32 to vector<16x16xi32>
      %549 = arith.cmpi slt, %543, %548 : vector<16x16xi32>
      %c7_i32_177 = arith.constant 7 : i32
      %550 = vector.broadcast %c7_i32_177 : i32 to vector<16x16xi32>
      %551 = arith.subi %543, %550 : vector<16x16xi32>
      %c37_i32_178 = arith.constant 37 : i32
      %552 = vector.broadcast %c37_i32_178 : i32 to vector<16x16xi32>
      %553 = arith.subi %552, %543 : vector<16x16xi32>
      %554 = arith.select %549, %551, %553 : vector<16x16xi1>, vector<16x16xi32>
      %555 = arith.select %545, %547, %554 : vector<16x16xi1>, vector<16x16xi32>
      %556 = arith.cmpi eq, %555, %331 : vector<16x16xi32>
      %cst_179 = arith.constant 0.000000e+00 : f32
      %557 = vector.broadcast %35 : f32 to vector<16x16xf32>
      %558 = vector.broadcast %cst_179 : f32 to vector<16x16xf32>
      %559 = arith.select %556, %557, %558 : vector<16x16xi1>, vector<16x16xf32>
      %560 = arith.addf %541, %559 : vector<16x16xf32>
      %c12_i32_180 = arith.constant 12 : i32
      %561 = vector.broadcast %c12_i32_180 : i32 to vector<16x16xi32>
      %562 = arith.addi %330, %561 : vector<16x16xi32>
      %c7_i32_181 = arith.constant 7 : i32
      %563 = vector.broadcast %c7_i32_181 : i32 to vector<16x16xi32>
      %564 = arith.cmpi slt, %562, %563 : vector<16x16xi32>
      %c7_i32_182 = arith.constant 7 : i32
      %565 = vector.broadcast %c7_i32_182 : i32 to vector<16x16xi32>
      %566 = arith.subi %565, %562 : vector<16x16xi32>
      %c23_i32_183 = arith.constant 23 : i32
      %567 = vector.broadcast %c23_i32_183 : i32 to vector<16x16xi32>
      %568 = arith.cmpi slt, %562, %567 : vector<16x16xi32>
      %c7_i32_184 = arith.constant 7 : i32
      %569 = vector.broadcast %c7_i32_184 : i32 to vector<16x16xi32>
      %570 = arith.subi %562, %569 : vector<16x16xi32>
      %c37_i32_185 = arith.constant 37 : i32
      %571 = vector.broadcast %c37_i32_185 : i32 to vector<16x16xi32>
      %572 = arith.subi %571, %562 : vector<16x16xi32>
      %573 = arith.select %568, %570, %572 : vector<16x16xi1>, vector<16x16xi32>
      %574 = arith.select %564, %566, %573 : vector<16x16xi1>, vector<16x16xi32>
      %575 = arith.cmpi eq, %574, %331 : vector<16x16xi32>
      %cst_186 = arith.constant 0.000000e+00 : f32
      %576 = vector.broadcast %37 : f32 to vector<16x16xf32>
      %577 = vector.broadcast %cst_186 : f32 to vector<16x16xf32>
      %578 = arith.select %575, %576, %577 : vector<16x16xi1>, vector<16x16xf32>
      %579 = arith.addf %560, %578 : vector<16x16xf32>
      %c13_i32_187 = arith.constant 13 : i32
      %580 = vector.broadcast %c13_i32_187 : i32 to vector<16x16xi32>
      %581 = arith.addi %330, %580 : vector<16x16xi32>
      %c7_i32_188 = arith.constant 7 : i32
      %582 = vector.broadcast %c7_i32_188 : i32 to vector<16x16xi32>
      %583 = arith.cmpi slt, %581, %582 : vector<16x16xi32>
      %c7_i32_189 = arith.constant 7 : i32
      %584 = vector.broadcast %c7_i32_189 : i32 to vector<16x16xi32>
      %585 = arith.subi %584, %581 : vector<16x16xi32>
      %c23_i32_190 = arith.constant 23 : i32
      %586 = vector.broadcast %c23_i32_190 : i32 to vector<16x16xi32>
      %587 = arith.cmpi slt, %581, %586 : vector<16x16xi32>
      %c7_i32_191 = arith.constant 7 : i32
      %588 = vector.broadcast %c7_i32_191 : i32 to vector<16x16xi32>
      %589 = arith.subi %581, %588 : vector<16x16xi32>
      %c37_i32_192 = arith.constant 37 : i32
      %590 = vector.broadcast %c37_i32_192 : i32 to vector<16x16xi32>
      %591 = arith.subi %590, %581 : vector<16x16xi32>
      %592 = arith.select %587, %589, %591 : vector<16x16xi1>, vector<16x16xi32>
      %593 = arith.select %583, %585, %592 : vector<16x16xi1>, vector<16x16xi32>
      %594 = arith.cmpi eq, %593, %331 : vector<16x16xi32>
      %cst_193 = arith.constant 0.000000e+00 : f32
      %595 = vector.broadcast %39 : f32 to vector<16x16xf32>
      %596 = vector.broadcast %cst_193 : f32 to vector<16x16xf32>
      %597 = arith.select %594, %595, %596 : vector<16x16xi1>, vector<16x16xf32>
      %598 = arith.addf %579, %597 : vector<16x16xf32>
      %c14_i32_194 = arith.constant 14 : i32
      %599 = vector.broadcast %c14_i32_194 : i32 to vector<16x16xi32>
      %600 = arith.addi %330, %599 : vector<16x16xi32>
      %c7_i32_195 = arith.constant 7 : i32
      %601 = vector.broadcast %c7_i32_195 : i32 to vector<16x16xi32>
      %602 = arith.cmpi slt, %600, %601 : vector<16x16xi32>
      %c7_i32_196 = arith.constant 7 : i32
      %603 = vector.broadcast %c7_i32_196 : i32 to vector<16x16xi32>
      %604 = arith.subi %603, %600 : vector<16x16xi32>
      %c23_i32_197 = arith.constant 23 : i32
      %605 = vector.broadcast %c23_i32_197 : i32 to vector<16x16xi32>
      %606 = arith.cmpi slt, %600, %605 : vector<16x16xi32>
      %c7_i32_198 = arith.constant 7 : i32
      %607 = vector.broadcast %c7_i32_198 : i32 to vector<16x16xi32>
      %608 = arith.subi %600, %607 : vector<16x16xi32>
      %c37_i32_199 = arith.constant 37 : i32
      %609 = vector.broadcast %c37_i32_199 : i32 to vector<16x16xi32>
      %610 = arith.subi %609, %600 : vector<16x16xi32>
      %611 = arith.select %606, %608, %610 : vector<16x16xi1>, vector<16x16xi32>
      %612 = arith.select %602, %604, %611 : vector<16x16xi1>, vector<16x16xi32>
      %613 = arith.cmpi eq, %612, %331 : vector<16x16xi32>
      %cst_200 = arith.constant 0.000000e+00 : f32
      %614 = vector.broadcast %41 : f32 to vector<16x16xf32>
      %615 = vector.broadcast %cst_200 : f32 to vector<16x16xf32>
      %616 = arith.select %613, %614, %615 : vector<16x16xi1>, vector<16x16xf32>
      %617 = arith.addf %598, %616 : vector<16x16xf32>
      %c0_201 = arith.constant 0 : index
      %c0_202 = arith.constant 0 : index
      %c0_203 = arith.constant 0 : index
      %618 = vector.load %arg6[%c0_201, %c0_202, %c0_203] : memref<1x16x16xf32, #tpu.memory_space<vmem>>, vector<1x16x16xf32>
      %619 = vector.shape_cast %618 : vector<1x16x16xf32> to vector<16x16xf32>
      %cst_204 = arith.constant dense<0.000000e+00> : vector<16x16xf32>
      %620 = tpu.matmul %619, %617, %cst_204 {dimension_numbers = #tpu.dot_dimension_numbers<[1], [0], [0], [1], [0, 0, 1, 1], [], []>} : vector<16x16xf32>, vector<16x16xf32>, vector<16x16xf32> -> vector<16x16xf32>
      %cst_205 = arith.constant dense<0.000000e+00> : vector<16x16xf32>
      %621 = tpu.matmul %329, %620, %cst_205 {dimension_numbers = #tpu.dot_dimension_numbers<[1], [0], [0], [1], [0, 0, 1, 1], [], []>} : vector<16x16xf32>, vector<16x16xf32>, vector<16x16xf32> -> vector<16x16xf32>
      %622 = vector.shape_cast %621 : vector<16x16xf32> to vector<1x16x16xf32>
      %c0_206 = arith.constant 0 : index
      %c0_207 = arith.constant 0 : index
      %c0_208 = arith.constant 0 : index
      %623 = vector.load %arg4[%c0_206, %c0_207, %c0_208] : memref<1x16x16xf32, #tpu.memory_space<vmem>>, vector<1x16x16xf32>
      %624 = arith.mulf %622, %623 : vector<1x16x16xf32>
      %c0_209 = arith.constant 0 : index
      %c0_210 = arith.constant 0 : index
      %c0_211 = arith.constant 0 : index
      %625 = vector.load %arg7[%c0_209, %c0_210, %c0_211] : memref<1x16x16xf32, #tpu.memory_space<vmem>>, vector<1x16x16xf32>
      %626 = arith.addf %624, %625 : vector<1x16x16xf32>
      %c0_212 = arith.constant 0 : index
      %c0_213 = arith.constant 0 : index
      %c0_214 = arith.constant 0 : index
      %627 = vector.load %arg6[%c0_212, %c0_213, %c0_214] : memref<1x16x16xf32, #tpu.memory_space<vmem>>, vector<1x16x16xf32>
      tpu.vector_store %arg6[%c0_212, %c0_213, %c0_214], %626 {strides = array<i32>} : memref<1x16x16xf32, #tpu.memory_space<vmem>>, vector<1x16x16xf32>,
      %c1_i32_215 = arith.constant 1 : i32
      %628 = arith.subi %0, %c1_i32_215 : i32
      %629 = arith.cmpi eq, %arg1, %628 : i32
      %630 = arith.extui %629 : i1 to i32
      %c0_i32_216 = arith.constant 0 : i32
      %631 = arith.cmpi ne, %630, %c0_i32_216 : i32
      scf.if %631 {
        %c0_217 = arith.constant 0 : index
        %c0_218 = arith.constant 0 : index
        %c0_219 = arith.constant 0 : index
        %632 = vector.load %arg5[%c0_217, %c0_218, %c0_219] : memref<1x16x16xf32, #tpu.memory_space<vmem>>, vector<1x16x16xf32>
        tpu.vector_store %arg5[%c0_217, %c0_218, %c0_219], %624 {strides = array<i32>} : memref<1x16x16xf32, #tpu.memory_space<vmem>>, vector<1x16x16xf32>,
      } else {
      }
    } else {
    }
    return
  }
  func.func @transform_0(%arg0: i32, %arg1: i32) -> i32 {
    %c0_i32 = arith.constant 0 : i32
    %c0_i32_0 = arith.constant 0 : i32
    return %c0_i32 : i32
  }
  func.func @transform_1(%arg0: i32, %arg1: i32) -> (i32, i32) {
    %c0_i32 = arith.constant 0 : i32
    %c0_i32_0 = arith.constant 0 : i32
    %c0_i32_1 = arith.constant 0 : i32
    return %c0_i32, %c0_i32_0 : i32, i32
  }
  func.func @transform_2(%arg0: i32, %arg1: i32) -> (i32, i32, i32) {
    %c0_i32 = arith.constant 0 : i32
    %c0_i32_0 = arith.constant 0 : i32
    %c0_i32_1 = arith.constant 0 : i32
    return %arg0, %c0_i32, %c0_i32_0 : i32, i32, i32
  }
  func.func @transform_3(%arg0: i32, %arg1: i32) -> (i32, i32, i32) {
    %c0_i32 = arith.constant 0 : i32
    %c0_i32_0 = arith.constant 0 : i32
    %c0_i32_1 = arith.constant 0 : i32
    return %arg0, %c0_i32, %c0_i32_0 : i32, i32, i32
  }
}

</mosaic_0001>

<bundles_post_ra>
// kernel: _forward_impl.1
= control target key start
LH: loop header
LB: loop body
LE: loop exit
PB: predicated region body
PF: predicated region fallthrough
CT: control target
= control target key end

     0   :  { %s1905_s0 = inlined_call_operand.<no memory space> [shape: s32[1], index: 0, kind: input, shape index: {}]   ;;  %s1906_s1 = inlined_call_operand.vmem [shape: f32[6,15], index: 1, kind: input, shape index: {}]   ;;  %s1907_s2 = inlined_call_operand.vmem [shape: f32[2,16,16], index: 2, kind: input, shape index: {}]   ;;  %s1908_s3 = inlined_call_operand.hbm [shape: f32[2,16,16], index: 3, kind: output, shape index: {}]  }
   0x1   :  { %1910 = sst [smem:[#allocation11_spill]] %s1906_s1 }
   0x2   :  { %1911 = sst [smem:[#allocation12_spill]] %s1907_s2 }
   0x3   :  { %8 = sst [smem:[#allocation4]] %s1905_s0 }
   0x4   :  { %9 = vsyncpa [#allocation7], 0 }
   0x5   :  { %10 = vsyncpa [#allocation6], 0 }
   0x6   :  { %12 = vsyncpa [#allocation6 + $0x1], 0  ;;  %s1403_s14 = smov 0   ;;  %s1405_s15 = smov 0  }
   0x7   :  { %s1407_s16 = smov 0   ;;  %s1409_s17 = smov 0  }
   0x8   :  { %s1411_s18 = smov 0   ;;  %s1413_s19 = smov 0  }
   0x9   :  { %s1415_s20 = smov 0   ;;  %s1417_s21 = smov 0  }
   0xa LB: > { %s1078_s0 = sadd.s32 4294967295, %s1373_s21   ;;  %s1079_s22 = sadd.s32 4294967294, %s1373_s21   ;;  %s1373_s21 = sphi %s1417_s21, %s18_s21   ;;  %s1369_s20 = sphi %s1415_s20, %s1926_s20   ;;  %s1365_s19 = sphi %s1413_s19, %s1925_s19   ;;  %s1361_s18 = sphi %s1411_s18, %s1924_s18   ;;  %s1357_s17 = sphi %s1409_s17, %s1923_s17   ;;  %s1353_s16 = sphi %s1407_s16, %s1922_s16   ;;  %s1349_s15 = sphi %s1405_s15, %s1921_s15   ;;  %s1345_s14 = sphi %s1403_s14, %s1920_s14  }
   0xb   : > { %s27_s23 = sadd.s32 1, %s1365_s19  ;;  %s30_s24 = sadd.s32 1, %s1369_s20 }
   0xc   : > { %p28_p0 = scmp.ge.s32.totalorder %s27_s23, 6  ;;  %s105_s25 = sadd.s32 1, %s1353_s16 }
   0xd   : > { %p115_p1 = scmp.ne.s32.totalorder %s1353_s16, %s1349_s15  ;;  %p116_p2 = scmp.eq.s32.totalorder %s1078_s0, 11 }
   0xe   : > { %s1928_s23 = smov (%p28_p0, %s27_s23), 0  ;;  %s1930_s24 = smov (!%p28_p0, %s30_s24), %s1369_s20 }
   0xf   : > { %p1453_p3 = por %p116_p2, %p115_p1  ;;  %p121_p4 = scmp.ne.s32.totalorder %s1349_s15, %s1345_s14 }
  0x10   : > { %p32_p5 = scmp.ge.s32.totalorder %s1930_s24, 2  ;;  %p122_p6 = scmp.eq.s32.totalorder %s1079_s22, 11 }
  0x11   : > { %p1080_p7 = scmp.ge.s32.totalorder %s1373_s21, 1  ;;  %p129_p8 = scmp.lt.s32.totalorder %s1373_s21, 13 }
  0x12   : > { %s1932_s24 = smov (%p32_p5, %s1930_s24), 0  ;;  %p1463_p9 = por %p122_p6, %p121_p4 }
  0x13   : > { %p1467_p10 = pnand %p1080_p7, %p129_p8  ;;  %s102_s29 = ssub.s32 %s1369_s20, %s1932_s24 }
  0x14   : > { %s1913_s27 = scalar_select %p1463_p9, 1, 0 }
  0x15   : > { %p103_p11 = scmp.eq.s32.totalorder %s102_s29, 0  ;;  %p1181_p12 = pneg %p1467_p10 }
  0x16   : > { %p1475_p13 = scmp.eq.s32.totalorder %s1078_s0, 0  ;;  %s1916_s1 = sld [smem:[#allocation11_spill]] }
  0x17   : > { %s1483_s7 = scalar_select %p103_p11, %s1353_s16, %s105_s25  }
  0x18   : > { %p1182_p0 = pnand %p1475_p13, %p1181_p12 }
  0x1a   : > { %p1262_p2 = pneg %p1182_p0 }
  0x1c   : > { %s145_s6 = sshll.u32 %s1916_s1, 4  ;;  %s146_s6 = int_to_ptr.vmem [resolvable:$true] %s145_s6 }
  0x1d   : > { %s1260_s8 = scalar_lea.vmem %s146_s6, 128  ;;  %p1268_p6 = scmp.lt.s32.totalorder %s146_s6, %s146_s6 }
  0x1e   : > { %p1261_p1 = scmp.ne.s32.totalorder %s146_s6, %s1260_s8  ;;  %p1269_p7 = scmp.lt.s32.totalorder %s1260_s8, %s1260_s8 }
  0x20   : > { %p1263_p4 = pnand %p1262_p2, %p1261_p1  ;;  %p1270_p8 = por %p1269_p7, %p1268_p6 }
  0x22   : > { %p1264_p5 = pneg %p1263_p4 }
  0x24   : > { %p1271_p9 = pnand %p1270_p8, %p1264_p5 }
  0x26   : > { %1274 = shalt.err (!%p1271_p9)
}
  0x27   : > { %s1375_s9 = smov [#allocation5]   ;;  %166 = sbr.rel (%p1467_p10) target bundleno = 600 (0x258), region = 32 }
  0x28   : > { %1184 = dma.vmem_to_smem (!%p1182_p0), %s146_s6, 128, %s1375_s9, [#allocation7]  }
  0x2e   : > { %1336 = dma.done.wait (%p1475_p13), [#allocation7], 128  }
  0x2f   : > { %1338 = vsyncadd (%p1475_p13), [#allocation7], 4294967168 }
  0x30   : > { %172 = sfence }
  0x31   : > { %s1909_s10 = sand.u32 1, %s1349_s15   ;;  %p191_p11 = scmp.lt.s32.totalorder %s1361_s18, 1 }
  0x32   : > { %s1085_s11 = sshll.u32 %s1909_s10, 4  ;;  %s1497_s12 = sld [smem:[#allocation4]] }
  0x33   : > { %p197_p9 = scmp.eq.s32.totalorder %s1357_s17, 0  ;;  %s1917_s2 = sld [smem:[#allocation12_spill]] }
  0x34   : > { %s192_s13 = scalar_select %p191_p11, %s1361_s18, 1 }
  0x35   : > { %s1506_s29 = scalar_lea.vmem [#allocation8], %s1085_s11  ;;  %p1088_p10 = scmp.ne.s32.totalorder %s1357_s17, 0 }
  0x36   : > { %s1143_s0 = sshll.u32 %s192_s13, 4  ;;  %vm205_vm0 = vcmask (!%p1088_p10), 130048  }
  0x37   : > { %200 = sbr.rel (%p1088_p10) target bundleno = 63 (0x3f), region = 40 }
  0x39   : > { %s1504_s28 = scalar_lea.vmem %s1917_s2, %s1143_s0 }
  0x3a   : > { %v201_v0 = vld [vmem:[%s1504_s28] sm:$0xff] (!%p1088_p10)  ;;  %v202_v1 = vld [vmem:[%s1504_s28 + $0x8] sm:$0xff] (!%p1088_p10) }
  0x3b   : > { %v203_v2 = vsub.f32 (!%p1088_p10), 1.0, %v201_v0  ;;  %v204_v3 = vsub.f32 (!%p1088_p10), 1.0, %v202_v1 }
  0x3d   : > { %206 = vst.msk [vmem:[#allocation3] sm:$0xff] (!%p1088_p10), %vm205_vm0, %v203_v2  ;;  %208 = vst.msk [vmem:[#allocation2] sm:$0xff] (!%p1088_p10), %vm205_vm0, %v203_v2 }
  0x3e   : > { %207 = vst.msk [vmem:[#allocation3 + $0x8] sm:$0xff] %vm205_vm0, %v204_v3  ;;  %209 = vst.msk [vmem:[#allocation2 + $0x8] sm:$0xff] %vm205_vm0, %v204_v3 }
  0x3f PF: > { %p210_p12 = scmp.eq.s32.totalorder %s1497_s12, 0 }
  0x41   : > { %p211_p13 = pnand %p210_p12, %p197_p9 }
  0x42   : > { %vm215_vm1 = vcmask (!%p211_p13), 130048   ;;  %v1376_v4 = vmov (!%p211_p13), 0.0  }
  0x43   : > { %214 = sbr.rel (%p211_p13) target bundleno = 74 (0x4a), region = 44  ;;  %216 = vst.msk [vmem:[%s1506_s29] sm:$0xff] (!%p211_p13), %vm215_vm1, %v1376_v4  ;;  %217 = vst.msk [vmem:[%s1506_s29 + $0x8] sm:$0xff] (!%p211_p13), %vm215_vm1, %v1376_v4 }
  0x4a PF: > { %p1089_p0 = scmp.ge.s32.totalorder %s1357_s17, %s1497_s12 }
  0x4b   : > { %s1519_s30 = sshll.u32 (!%p1089_p0), %s1357_s17, 7  ;;  %v252_v5 = vlaneseq (!%p1089_p0)  ;;  %v797_v6 = vld [vmem:[#allocation2] sm:$0xff] (!%p1089_p0)  ;;  %vm799_vm2 = vcmask (!%p1089_p0), 130048  }
  0x4c   : > { %221 = sbr.rel (%p1089_p0) target bundleno = 574 (0x23e), region = 48  ;;  %s223_s4 = sld [smem:[#allocation5 + %s1519_s30]] (!%p1089_p0)  ;;  %1157 = vmatprep.mubr.msk.f32.mxu0 (!%p1089_p0), %vm799_vm2, %v797_v6 }
  0x4d   : > { %s224_s5 = sadd.s32 (!%p1089_p0), 1, %s1519_s30  ;;  %s226_s8 = sadd.s32 (!%p1089_p0), 2, %s1519_s30  ;;  %v1527_v7 = vshrl.u32 (!%p1089_p0), %v252_v5, 7  ;;  %v1529_v8 = vand.u32 (!%p1089_p0), 127, %v252_v5 }
  0x4e   : > { %s1524_s6 = sld [smem:[#allocation5 + %s224_s5]] (!%p1089_p0)  ;;  %s228_s11 = sadd.s32 (!%p1089_p0), 3, %s1519_s30 }
  0x4f   : > { %s1531_s9 = sld [smem:[#allocation5 + %s226_s8]] (!%p1089_p0)  ;;  %s230_s0 = sadd.s32 (!%p1089_p0), 4, %s1519_s30  ;;  %v1538_v9 = vadd.s32 (!%p1089_p0), 8, %v1527_v7  ;;  %v590_v10 = vsub.s32 (!%p1089_p0), 7, %v1529_v8  ;;  %vm591_vm3 = vcmp.lt.s32.totalorder (!%p1089_p0), %v1529_v8, 23  ;;  %vm589_vm4 = vcmp.lt.s32.totalorder (!%p1089_p0), %v1529_v8, 7 }
  0x50   : > { %s1534_s13 = sld [smem:[#allocation5 + %s228_s11]] (!%p1089_p0)  ;;  %s232_s25 = sadd.s32 (!%p1089_p0), 5, %s1519_s30  ;;  %v1118_v11 = vadd.s32 (!%p1089_p0), 4294967289, %v1529_v8  ;;  %v593_v12 = vsub.s32 (!%p1089_p0), 37, %v1529_v8  ;;  %v602_v13 = vadd.s32 (!%p1089_p0), 1, %v1529_v8  ;;  %v616_v14 = vadd.s32 (!%p1089_p0), 2, %v1529_v8 }
  0x51   : > { %s1542_s22 = sld [smem:[#allocation5 + %s230_s0]] (!%p1089_p0)  ;;  %s234_s8 = sadd.s32 (!%p1089_p0), 6, %s1519_s30  ;;  %v1554_v15 = vadd.s32 (!%p1089_p0), 3, %v1529_v8  ;;  %v1557_v16 = vadd.s32 (!%p1089_p0), 4, %v1529_v8  ;;  %v1565_v19 = vadd.s32 (!%p1089_p0), 5, %v1529_v8  ;;  %v1568_v20 = vadd.s32 (!%p1089_p0), 6, %v1529_v8 }
  0x52   : > { %s1549_s5 = sld [smem:[#allocation5 + %s232_s25]] (!%p1089_p0)  ;;  %s236_s0 = sadd.s32 (!%p1089_p0), 7, %s1519_s30  ;;  %v1562_v17 = vstv (!%p1089_p0), %s223_s4  ;;  %v594_v18 = vsel (!%p1089_p0), %vm591_vm3, %v1118_v11, %v593_v12  ;;  %v604_v22 = vsub.s32 (!%p1089_p0), 7, %v602_v13  ;;  %vm605_vm5 = vcmp.lt.s32.totalorder (!%p1089_p0), %v602_v13, 23 }
  0x53   : > { %s1559_s11 = sld [smem:[#allocation5 + %s234_s8]]  ;;  %s238_s10 = sadd.s32 8, %s1519_s30  ;;  %v595_v21 = vsel %vm589_vm4, %v590_v10, %v594_v18  ;;  %v1119_v23 = vadd.s32 4294967289, %v602_v13  ;;  %vm603_vm8 = vcmp.lt.s32.totalorder %v602_v13, 7  ;;  %v607_v24 = vsub.s32 37, %v602_v13 }
  0x54   : > { %s1570_s25 = sld [smem:[#allocation5 + %s236_s0]]  ;;  %s240_s8 = sadd.s32 9, %s1519_s30  ;;  %vm596_vm6 = vcmp.eq.s32.totalorder %v595_v21, %v1527_v7  ;;  %vm597_vm7 = vcmp.eq.s32.totalorder %v595_v21, %v1538_v9  ;;  %v1584_v25 = vstv %s1524_s6  ;;  %v618_v31 = vsub.s32 7, %v616_v14 }
  0x55   : > { %s1575_s4 = sld [smem:[#allocation5 + %s238_s10]]  ;;  %s242_s1 = sadd.s32 10, %s1519_s30  ;;  %v1587_v26 = vstv %s1531_s9  ;;  %v598_v28 = vsel %vm596_vm6, %v1562_v17, 0.0  ;;  %v599_v29 = vsel %vm597_vm7, %v1562_v17, 0.0  ;;  %v608_v30 = vsel %vm605_vm5, %v1119_v23, %v607_v24 }
  0x56   : > { %s1580_s0 = sld [smem:[#allocation5 + %s240_s8]]  ;;  %v1590_v27 = vstv %s1534_s13  ;;  %s244_s2 = sadd.s32 11, %s1519_s30  ;;  %vm619_vm9 = vcmp.lt.s32.totalorder %v616_v14, 23  ;;  %v609_v32 = vsel %vm603_vm8, %v604_v22, %v608_v30  ;;  %vm617_vm10 = vcmp.lt.s32.totalorder %v616_v14, 7 }
  0x57   : > { %s1593_s10 = sld [smem:[#allocation5 + %s242_s1]]  ;;  %s246_s8 = sadd.s32 12, %s1519_s30  ;;  %v1120_v33 = vadd.s32 4294967289, %v616_v14  ;;  %v621_v34 = vsub.s32 37, %v616_v14  ;;  %v1603_v35 = vstv %s1542_s22  ;;  %vm610_vm11 = vcmp.eq.s32.totalorder %v609_v32, %v1527_v7 }
  0x58   : > { %s245_s6 = sld [smem:[#allocation5 + %s244_s2]]  ;;  %v1606_v36 = vstv %s1549_s5  ;;  %vm611_vm12 = vcmp.eq.s32.totalorder %v609_v32, %v1538_v9  ;;  %v612_v38 = vsel %vm610_vm11, %v1584_v25, 0.0  ;;  %vm631_vm13 = vcmp.lt.s32.totalorder %v1554_v15, 7  ;;  %s248_s1 = sadd.s32 13, %s1519_s30 }
  0x59   : > { %s1600_s9 = sld [smem:[#allocation5 + %s246_s8]]  ;;  %v1611_v37 = vstv %s1559_s11  ;;  %v613_v39 = vsel %vm611_vm12, %v1584_v25, 0.0  ;;  %v622_v40 = vsel %vm619_vm9, %v1120_v33, %v621_v34  ;;  %v614_v41 = vadd.f32 %v612_v38, %v598_v28  ;;  %s250_s13 = sadd.s32 14, %s1519_s30 }
  0x5a   : > { %v615_v42 = vadd.f32 %v613_v39, %v599_v29  ;;  %v623_v43 = vsel %vm617_vm10, %v618_v31, %v622_v40  ;;  %v1617_v44 = vstv %s1570_s25  ;;  %v632_v49 = vsub.s32 7, %v1554_v15  ;;  %s1680_s2 = sld [smem:[#allocation5 + %s248_s1]]  ;;  %s1136_s30 = sadd.s32 4294967295, %s1497_s12 }
  0x5b   : > { %v1620_v45 = vstv %s1575_s4  ;;  %vm624_vm14 = vcmp.eq.s32.totalorder %v623_v43, %v1527_v7  ;;  %vm625_vm15 = vcmp.eq.s32.totalorder %v623_v43, %v1538_v9  ;;  %vm633_vm0 = vcmp.lt.s32.totalorder %v1554_v15, 23  ;;  %s1710_s22 = sld [smem:[#allocation5 + %s250_s13]]  ;;  %p1137_p1 = scmp.ne.s32.totalorder %s1357_s17, %s1136_s30 }
  0x5c   : > { %v1625_v46 = vstv %s1580_s0  ;;  %v626_v47 = vsel %vm624_vm14, %v1587_v26, 0.0  ;;  %v627_v48 = vsel %vm625_vm15, %v1587_v26, 0.0  ;;  %v1121_v52 = vadd.s32 4294967289, %v1554_v15 }
  0x5d   : > { %v1631_v50 = vstv %s1593_s10  ;;  %v628_v53 = vadd.f32 %v626_v47, %v614_v41  ;;  %v629_v54 = vadd.f32 %v627_v48, %v615_v42  ;;  %v635_v55 = vsub.s32 37, %v1554_v15 }
  0x5e   : > { %v1633_v51 = vstv %s245_s6  ;;  %v646_v56 = vsub.s32 7, %v1557_v16  ;;  %vm645_vm1 = vcmp.lt.s32.totalorder %v1557_v16, 7  ;;  %vm647_vm3 = vcmp.lt.s32.totalorder %v1557_v16, 23 }
  0x5f   : > { %v1122_v57 = vadd.s32 4294967289, %v1557_v16  ;;  %v649_v58 = vsub.s32 37, %v1557_v16  ;;  %v1644_v59 = vstv %s1600_s9  ;;  %v636_v60 = vsel %vm633_vm0, %v1121_v52, %v635_v55 }
  0x60   : > { %vm659_vm4 = vcmp.lt.s32.totalorder %v1565_v19, 7  ;;  %v660_v61 = vsub.s32 7, %v1565_v19  ;;  %v637_v62 = vsel %vm631_vm13, %v632_v49, %v636_v60  ;;  %vm661_vm5 = vcmp.lt.s32.totalorder %v1565_v19, 23 }
  0x61   : > { %v650_v63 = vsel %vm647_vm3, %v1122_v57, %v649_v58  ;;  %v1123_v0 = vadd.s32 4294967289, %v1565_v19  ;;  %vm638_vm6 = vcmp.eq.s32.totalorder %v637_v62, %v1527_v7  ;;  %vm639_vm7 = vcmp.eq.s32.totalorder %v637_v62, %v1538_v9 }
  0x62   : > { %v651_v1 = vsel %vm645_vm1, %v646_v56, %v650_v63  ;;  %v663_v2 = vsub.s32 37, %v1565_v19  ;;  %v640_v3 = vsel %vm638_vm6, %v1590_v27, 0.0  ;;  %v641_v4 = vsel %vm639_vm7, %v1590_v27, 0.0 }
  0x63   : > { %vm652_vm8 = vcmp.eq.s32.totalorder %v651_v1, %v1527_v7  ;;  %vm653_vm9 = vcmp.eq.s32.totalorder %v651_v1, %v1538_v9  ;;  %v642_v5 = vadd.f32 %v640_v3, %v628_v53  ;;  %v643_v6 = vadd.f32 %v641_v4, %v629_v54 }
  0x64   : > { %v654_v10 = vsel %vm652_vm8, %v1603_v35, 0.0  ;;  %v655_v11 = vsel %vm653_vm9, %v1603_v35, 0.0  ;;  %v664_v12 = vsel %vm661_vm5, %v1123_v0, %v663_v2  ;;  %vm673_vm10 = vcmp.lt.s32.totalorder %v1568_v20, 7 }
  0x65   : > { %v674_v13 = vsub.s32 7, %v1568_v20  ;;  %vm675_vm11 = vcmp.lt.s32.totalorder %v1568_v20, 23  ;;  %v656_v14 = vadd.f32 %v654_v10, %v642_v5  ;;  %v657_v15 = vadd.f32 %v655_v11, %v643_v6 }
  0x66   : > { %v665_v16 = vsel %vm659_vm4, %v660_v61, %v664_v12  ;;  %v1124_v18 = vadd.s32 4294967289, %v1568_v20  ;;  %v677_v21 = vsub.s32 37, %v1568_v20  ;;  %v686_v22 = vadd.s32 7, %v1529_v8 }
  0x67   : > { %vm666_vm12 = vcmp.eq.s32.totalorder %v665_v16, %v1527_v7  ;;  %vm667_vm13 = vcmp.eq.s32.totalorder %v665_v16, %v1538_v9  ;;  %v699_v28 = vadd.s32 8, %v1529_v8  ;;  %v713_v19 = vadd.s32 9, %v1529_v8 }
  0x68   : > { %v668_v23 = vsel %vm666_vm12, %v1606_v36, 0.0  ;;  %v669_v24 = vsel %vm667_vm13, %v1606_v36, 0.0  ;;  %v678_v31 = vsel %vm675_vm11, %v1124_v18, %v677_v21  ;;  %vm689_vm14 = vcmp.lt.s32.totalorder %v686_v22, 23 }
  0x69   : > { %v670_v29 = vadd.f32 %v668_v23, %v656_v14  ;;  %v671_v30 = vadd.f32 %v669_v24, %v657_v15  ;;  %v679_v32 = vsel %vm673_vm10, %v674_v13, %v678_v31  ;;  %v690_v33 = vsub.s32 37, %v686_v22 }
  0x6a   : > { %vm702_vm15 = vcmp.lt.s32.totalorder %v699_v28, 23  ;;  %v1125_v34 = vadd.s32 4294967289, %v699_v28  ;;  %vm680_vm0 = vcmp.eq.s32.totalorder %v679_v32, %v1527_v7  ;;  %vm681_vm1 = vcmp.eq.s32.totalorder %v679_v32, %v1538_v9 }
  0x6b   : > { %v704_v38 = vsub.s32 37, %v699_v28  ;;  %vm716_vm3 = vcmp.lt.s32.totalorder %v713_v19, 23  ;;  %v682_v39 = vsel %vm680_vm0, %v1611_v37, 0.0  ;;  %v683_v40 = vsel %vm681_vm1, %v1611_v37, 0.0 }
  0x6c   : > { %v691_v41 = vsel %vm689_vm14, %v1529_v8, %v690_v33  ;;  %v1126_v42 = vadd.s32 4294967289, %v713_v19  ;;  %v684_v20 = vadd.f32 %v682_v39, %v670_v29  ;;  %v685_v43 = vadd.f32 %v683_v40, %v671_v30 }
  0x6d   : > { %vm693_vm4 = vcmp.eq.s32.totalorder %v691_v41, %v1527_v7  ;;  %vm694_vm5 = vcmp.eq.s32.totalorder %v691_v41, %v1538_v9  ;;  %v705_v49 = vsel %vm702_vm15, %v1125_v34, %v704_v38  ;;  %v718_v52 = vsub.s32 37, %v713_v19 }
  0x6e   : > { %v695_v47 = vsel %vm693_vm4, %v1617_v44, 0.0  ;;  %v696_v48 = vsel %vm694_vm5, %v1617_v44, 0.0  ;;  %vm707_vm6 = vcmp.eq.s32.totalorder %v705_v49, %v1527_v7  ;;  %vm708_vm7 = vcmp.eq.s32.totalorder %v705_v49, %v1538_v9 }
  0x6f   : > { %v697_v53 = vadd.f32 %v695_v47, %v684_v20  ;;  %v698_v54 = vadd.f32 %v696_v48, %v685_v43  ;;  %v709_v55 = vsel %vm707_vm6, %v1620_v45, 0.0  ;;  %v710_v56 = vsel %vm708_vm7, %v1620_v45, 0.0 }
  0x70   : > { %v719_v57 = vsel %vm716_vm3, %v1126_v42, %v718_v52  ;;  %v727_v58 = vadd.s32 10, %v1529_v8  ;;  %v1704_v1 = vstv %s1680_s2  ;;  %v741_v4 = vadd.s32 11, %v1529_v8 }
  0x71   : > { %v711_v60 = vadd.f32 %v709_v55, %v697_v53  ;;  %v712_v61 = vadd.f32 %v710_v56, %v698_v54  ;;  %vm721_vm8 = vcmp.eq.s32.totalorder %v719_v57, %v1527_v7  ;;  %vm722_vm9 = vcmp.eq.s32.totalorder %v719_v57, %v1538_v9 }
  0x72   : > { %v723_v62 = vsel %vm721_vm8, %v1625_v46, 0.0  ;;  %v724_v63 = vsel %vm722_vm9, %v1625_v46, 0.0  ;;  %vm730_vm10 = vcmp.lt.s32.totalorder %v727_v58, 23  ;;  %v1127_v0 = vadd.s32 4294967289, %v727_v58 }
  0x73   : > { %v725_v2 = vadd.f32 %v723_v62, %v711_v60  ;;  %v732_v3 = vsub.s32 37, %v727_v58  ;;  %v726_v5 = vadd.f32 %v724_v63, %v712_v61  ;;  %v755_v6 = vadd.s32 12, %v1529_v8  ;;  %v798_v60 = vld [vmem:[#allocation2 + $0x8] sm:$0xff] }
  0x74   : > { %v769_v10 = vadd.s32 13, %v1529_v8  ;;  %v783_v11 = vadd.s32 14, %v1529_v8  ;;  %vm744_vm11 = vcmp.lt.s32.totalorder %v741_v4, 23  ;;  %v1128_v13 = vadd.s32 4294967289, %v741_v4 }
  0x75   : > { %v733_v12 = vsel %vm730_vm10, %v1127_v0, %v732_v3  ;;  %v746_v14 = vsub.s32 37, %v741_v4  ;;  %vm758_vm14 = vcmp.lt.s32.totalorder %v755_v6, 23  ;;  %v1129_v15 = vadd.s32 4294967289, %v755_v6 }
  0x76   : > { %vm735_vm12 = vcmp.eq.s32.totalorder %v733_v12, %v1527_v7  ;;  %vm736_vm13 = vcmp.eq.s32.totalorder %v733_v12, %v1538_v9  ;;  %v760_v22 = vsub.s32 37, %v755_v6  ;;  %vm772_vm1 = vcmp.lt.s32.totalorder %v769_v10, 23 }
  0x77   : > { %v737_v16 = vsel %vm735_vm12, %v1631_v50, 0.0  ;;  %v738_v18 = vsel %vm736_vm13, %v1631_v50, 0.0  ;;  %v747_v21 = vsel %vm744_vm11, %v1128_v13, %v746_v14  ;;  %v1130_v34 = vadd.s32 4294967289, %v769_v10 }
  0x78   : > { %v739_v23 = vadd.f32 %v737_v16, %v725_v2  ;;  %v740_v24 = vadd.f32 %v738_v18, %v726_v5  ;;  %vm749_vm15 = vcmp.eq.s32.totalorder %v747_v21, %v1527_v7  ;;  %vm750_vm0 = vcmp.eq.s32.totalorder %v747_v21, %v1538_v9 }
  0x79   : > { %v751_v28 = vsel %vm749_vm15, %v1633_v51, 0.0  ;;  %v752_v19 = vsel %vm750_vm0, %v1633_v51, 0.0  ;;  %v761_v29 = vsel %vm758_vm14, %v1129_v15, %v760_v22  ;;  %v774_v38 = vsub.s32 37, %v769_v10 }
  0x7a   : > { %v753_v30 = vadd.f32 %v751_v28, %v739_v23  ;;  %v754_v31 = vadd.f32 %v752_v19, %v740_v24  ;;  %vm763_vm3 = vcmp.eq.s32.totalorder %v761_v29, %v1527_v7  ;;  %vm764_vm4 = vcmp.eq.s32.totalorder %v761_v29, %v1538_v9 }
  0x7b   : > { %v765_v32 = vsel %vm763_vm3, %v1644_v59, 0.0  ;;  %v766_v33 = vsel %vm764_vm4, %v1644_v59, 0.0  ;;  %vm786_vm5 = vcmp.lt.s32.totalorder %v783_v11, 23  ;;  %v1131_v41 = vadd.s32 4294967289, %v783_v11 }
  0x7c   : > { %v767_v39 = vadd.f32 %v765_v32, %v753_v30  ;;  %v768_v40 = vadd.f32 %v766_v33, %v754_v31  ;;  %v775_v42 = vsel %vm772_vm1, %v1130_v34, %v774_v38  ;;  %v788_v20 = vsub.s32 37, %v783_v11 }
  0x7d   : > { %v1725_v43 = vstv %s1710_s22  ;;  %vm777_vm6 = vcmp.eq.s32.totalorder %v775_v42, %v1527_v7  ;;  %vm778_vm7 = vcmp.eq.s32.totalorder %v775_v42, %v1538_v9  ;;  %v278_v61 = vadd.s32 1, %v1527_v7 }
  0x7e   : > { %v779_v47 = vsel %vm777_vm6, %v1704_v1, 0.0  ;;  %v780_v48 = vsel %vm778_vm7, %v1704_v1, 0.0  ;;  %v789_v49 = vsel %vm786_vm5, %v1131_v41, %v788_v20  ;;  %v259_v62 = vsub.s32 7, %v1527_v7 }
  0x7f   : > { %v781_v52 = vadd.f32 %v779_v47, %v767_v39  ;;  %v782_v53 = vadd.f32 %v780_v48, %v768_v40  ;;  %vm791_vm8 = vcmp.eq.s32.totalorder %v789_v49, %v1527_v7  ;;  %vm792_vm9 = vcmp.eq.s32.totalorder %v789_v49, %v1538_v9 }
  0x80   : > { %v793_v54 = vsel %vm791_vm8, %v1725_v43, 0.0  ;;  %v794_v55 = vsel %vm792_vm9, %v1725_v43, 0.0  ;;  %v1091_v63 = vadd.s32 4294967289, %v1527_v7  ;;  %v282_v0 = vsub.s32 7, %v278_v61 }
  0x81   : > { %v795_v56 = vadd.f32 %v793_v54, %v781_v52  ;;  %v796_v57 = vadd.f32 %v794_v55, %v782_v53  ;;  %vm257_vm10 = vcmp.lt.s32.totalorder %v1527_v7, 7  ;;  %vm280_vm11 = vcmp.lt.s32.totalorder %v278_v61, 7 }
  0x82   : > { %v1093_v2 = vadd.s32 4294967289, %v278_v61  ;;  %v301_v3 = vadd.s32 2, %v1527_v7  ;;  %v269_v4 = vsel %vm257_vm10, %v259_v62, %v1091_v63  ;;  %v324_v14 = vadd.s32 3, %v1527_v7 }
  0x83   : > { %v1167_v58 = vpack.c.bf16 %v796_v57, %v795_v56  ;;  %vm271_vm12 = vcmp.eq.s32.totalorder %v269_v4, %v1529_v8  ;;  %v347_v16 = vadd.s32 4, %v1527_v7  ;;  %v370_v29 = vadd.s32 5, %v1527_v7 }
  0x84   : > { %v292_v5 = vsel %vm280_vm11, %v282_v0, %v1093_v2  ;;  %v305_v6 = vsub.s32 7, %v301_v3  ;;  %v274_v10 = vsel %vm271_vm12, %v1562_v17, 0.0  ;;  %vm303_vm14 = vcmp.lt.s32.totalorder %v301_v3, 7 }
  0x85   : > { %1168 = vmatprep.subr.bf16.mxu0 %v1167_v58  ;;  %vm294_vm13 = vcmp.eq.s32.totalorder %v292_v5, %v1529_v8  ;;  %v1095_v12 = vadd.s32 4294967289, %v301_v3  ;;  %vm326_vm0 = vcmp.lt.s32.totalorder %v324_v14, 7  ;;  %v328_v18 = vsub.s32 7, %v324_v14 }
  0x86   : > { %1170 = vmatpush3.bf16.msra.mxu0 %v1167_v58  ;;  %v297_v11 = vsel %vm294_vm13, %v1584_v25, 0.0  ;;  %v1097_v22 = vadd.s32 4294967289, %v324_v14  ;;  %vm349_vm1 = vcmp.lt.s32.totalorder %v347_v16, 7  ;;  %v351_v24 = vsub.s32 7, %v347_v16 }
  0x87   : > { %v299_v13 = vadd.f32 %v297_v11, %v274_v10  ;;  %v315_v15 = vsel %vm303_vm14, %v305_v6, %v1095_v12  ;;  %v1099_v19 = vadd.s32 4294967289, %v347_v16  ;;  %v393_v30 = vadd.s32 6, %v1527_v7 }
  0x88   : > { %vm317_vm15 = vcmp.eq.s32.totalorder %v315_v15, %v1529_v8  ;;  %v338_v28 = vsel %vm326_vm0, %v328_v18, %v1097_v22  ;;  %vm372_vm5 = vcmp.lt.s32.totalorder %v370_v29, 7  ;;  %v374_v38 = vsub.s32 7, %v370_v29 }
  0x89   : > { %1158 = vmatmul.mubr.msk.f32.vlgmr.msra.gmra.mrb[0].mxu0 %vm799_vm2, %v798_v60  ;;  %v320_v21 = vsel %vm317_vm15, %v1587_v26, 0.0  ;;  %vm340_vm3 = vcmp.eq.s32.totalorder %v338_v28, %v1529_v8  ;;  %v361_v32 = vsel %vm349_vm1, %v351_v24, %v1099_v19  ;;  %v1101_v39 = vadd.s32 4294967289, %v370_v29 }
  0x8a   : > { %v322_v23 = vadd.f32 %v320_v21, %v299_v13  ;;  %v343_v31 = vsel %vm340_vm3, %v1590_v27, 0.0  ;;  %vm363_vm4 = vcmp.eq.s32.totalorder %v361_v32, %v1529_v8  ;;  %vm395_vm6 = vcmp.lt.s32.totalorder %v393_v30, 7 }
  0x8b   : > { %v366_v34 = vsel %vm363_vm4, %v1603_v35, 0.0  ;;  %v397_v41 = vsub.s32 7, %v393_v30  ;;  %v1103_v42 = vadd.s32 4294967289, %v393_v30  ;;  %v384_v20 = vsel %vm372_vm5, %v374_v38, %v1101_v39 }
  0x8c   : > { %v345_v33 = vadd.f32 %v343_v31, %v322_v23  ;;  %v451_v47 = vadd.s32 9, %v1527_v7  ;;  %v474_v48 = vadd.s32 10, %v1527_v7  ;;  %v1092_v49 = vadd.s32 4294967289, %v1538_v9 }
  0x8d   : > { %vm386_vm7 = vcmp.eq.s32.totalorder %v384_v20, %v1529_v8  ;;  %v407_v52 = vsel %vm395_vm6, %v397_v41, %v1103_v42  ;;  %vm430_vm8 = vcmp.eq.s32.totalorder %v1527_v7, %v1529_v8  ;;  %v497_v58 = vadd.s32 11, %v1527_v7 }
  0x8e   : > { %v368_v40 = vadd.f32 %v366_v34, %v345_v33  ;;  %v389_v53 = vsel %vm386_vm7, %v1606_v36, 0.0  ;;  %vm409_vm9 = vcmp.eq.s32.totalorder %v407_v52, %v1529_v8  ;;  %v1106_v54 = vadd.s32 4294967289, %v451_v47 }
  0x8f   : > { %v412_v56 = vsel %vm409_vm9, %v1611_v37, 0.0  ;;  %v1108_v57 = vadd.s32 4294967289, %v474_v48  ;;  %v433_v60 = vsel %vm430_vm8, %v1617_v44, 0.0  ;;  %v520_v61 = vadd.s32 12, %v1527_v7 }
  0x90   : > { %v391_v55 = vadd.f32 %v389_v53, %v368_v40  ;;  %vm272_vm10 = vcmp.eq.s32.totalorder %v1092_v49, %v1529_v8  ;;  %vm467_vm11 = vcmp.eq.s32.totalorder %v1106_v54, %v1529_v8  ;;  %v1110_v63 = vadd.s32 4294967289, %v497_v58 }
  0x91   : > { %v447_v0 = vsel %vm272_vm10, %v1620_v45, 0.0  ;;  %v543_v2 = vadd.s32 13, %v1527_v7  ;;  %vm490_vm12 = vcmp.eq.s32.totalorder %v1108_v57, %v1529_v8  ;;  %v1112_v4 = vadd.s32 4294967289, %v520_v61 }
  0x92   : > { %v414_v62 = vadd.f32 %v412_v56, %v391_v55  ;;  %v470_v5 = vsel %vm467_vm11, %v1625_v46, 0.0  ;;  %v566_v6 = vadd.s32 14, %v1527_v7  ;;  %vm513_vm13 = vcmp.eq.s32.totalorder %v1110_v63, %v1529_v8 }
  0x93   : > { %v1114_v11 = vadd.s32 4294967289, %v543_v2  ;;  %v493_v12 = vsel %vm490_vm12, %v1631_v50, 0.0  ;;  %vm536_vm14 = vcmp.eq.s32.totalorder %v1112_v4, %v1529_v8  ;;  %v516_v15 = vsel %vm513_vm13, %v1633_v51, 0.0 }
  0x94   : > { %v435_v3 = vadd.f32 %v433_v60, %v414_v62  ;;  %v1116_v14 = vadd.s32 4294967289, %v566_v6  ;;  %v539_v18 = vsel %vm536_vm14, %v1644_v59, 0.0  ;;  %v279_v19 = vadd.s32 1, %v1538_v9 }
  0x95   : > { %vm559_vm15 = vcmp.eq.s32.totalorder %v1114_v11, %v1529_v8  ;;  %v302_v30 = vadd.s32 2, %v1538_v9  ;;  %v325_v32 = vadd.s32 3, %v1538_v9  ;;  %v275_v33 = vsel %vm272_vm10, %v1562_v17, 0.0 }
  0x96   : > { %v449_v10 = vadd.f32 %v447_v0, %v435_v3  ;;  %vm582_vm0 = vcmp.eq.s32.totalorder %v1116_v14, %v1529_v8  ;;  %v562_v7 = vsel %vm559_vm15, %v1704_v1, 0.0  ;;  %v1094_v29 = vadd.s32 4294967289, %v279_v19 }
  0x97   : > { %v585_v23 = vsel %vm582_vm0, %v1725_v43, 0.0  ;;  %v1096_v31 = vadd.s32 4294967289, %v302_v30  ;;  %v1098_v38 = vadd.s32 4294967289, %v325_v32  ;;  %v348_v39 = vadd.s32 4, %v1538_v9 }
  0x98   : > { %v472_v13 = vadd.f32 %v470_v5, %v449_v10  ;;  %vm295_vm1 = vcmp.eq.s32.totalorder %v1094_v29, %v1529_v8  ;;  %v371_v20 = vadd.s32 5, %v1538_v9  ;;  %v452_v57 = vadd.s32 9, %v1538_v9 }
  0x99   : > { %v298_v34 = vsel %vm295_vm1, %v1584_v25, 0.0  ;;  %vm318_vm3 = vcmp.eq.s32.totalorder %v1096_v31, %v1529_v8  ;;  %vm341_vm4 = vcmp.eq.s32.totalorder %v1098_v38, %v1529_v8  ;;  %v1100_v42 = vadd.s32 4294967289, %v348_v39 }
  0x9a   : > { %v495_v16 = vadd.f32 %v493_v12, %v472_v13  ;;  %v300_v40 = vadd.f32 %v298_v34, %v275_v33  ;;  %v321_v41 = vsel %vm318_vm3, %v1587_v26, 0.0  ;;  %v344_v48 = vsel %vm341_vm4, %v1590_v27, 0.0 }
  0x9b   : > { %vm364_vm5 = vcmp.eq.s32.totalorder %v1100_v42, %v1529_v8  ;;  %v1102_v17 = vadd.s32 4294967289, %v371_v20  ;;  %v394_v25 = vadd.s32 6, %v1538_v9  ;;  %v437_v26 = vadd.s32 8, %v1538_v9  ;;  %v962_v20 = vld [vmem:[%s1504_s28] sm:$0xff] }
  0x9c   : > { %v518_v21 = vadd.f32 %v516_v15, %v495_v16  ;;  %v323_v47 = vadd.f32 %v321_v41, %v300_v40  ;;  %v367_v52 = vsel %vm364_vm5, %v1603_v35, 0.0  ;;  %vm431_vm9 = vcmp.eq.s32.totalorder %v1538_v9, %v1529_v8 }
  0x9d   : > { %vm387_vm6 = vcmp.eq.s32.totalorder %v1102_v17, %v1529_v8  ;;  %v1104_v53 = vadd.s32 4294967289, %v394_v25  ;;  %v1105_v56 = vadd.s32 4294967289, %v437_v26  ;;  %v442_v27 = vsub.s32 37, %v437_v26  ;;  %v966_v25 = vld [vmem:[#allocation3] sm:$0xff] }
  0x9e   : > { %v541_v22 = vadd.f32 %v539_v18, %v518_v21  ;;  %v346_v49 = vadd.f32 %v344_v48, %v323_v47  ;;  %v390_v55 = vsel %vm387_vm6, %v1606_v36, 0.0  ;;  %vm440_vm8 = vcmp.lt.s32.totalorder %v437_v26, 23  ;;  %v967_v48 = vld [vmem:[#allocation3 + $0x8] sm:$0xff] }
  0x9f   : > { %vm410_vm7 = vcmp.eq.s32.totalorder %v1104_v53, %v1529_v8  ;;  %v443_v35 = vsel %vm440_vm8, %v1105_v56, %v442_v27  ;;  %v1107_v61 = vadd.s32 4294967289, %v452_v57  ;;  %v462_v62 = vsub.s32 37, %v452_v57 }
  0xa0   : > { %v564_v24 = vadd.f32 %v562_v7, %v541_v22  ;;  %v369_v54 = vadd.f32 %v367_v52, %v346_v49  ;;  %v413_v60 = vsel %vm410_vm7, %v1611_v37, 0.0  ;;  %v475_v63 = vadd.s32 10, %v1538_v9 }
  0xa1   : > { %vm458_vm10 = vcmp.lt.s32.totalorder %v452_v57, 23  ;;  %v434_v36 = vsel %vm431_vm9, %v1617_v44, 0.0  ;;  %vm445_vm11 = vcmp.eq.s32.totalorder %v443_v35, %v1529_v8  ;;  %v498_v5 = vadd.s32 11, %v1538_v9 }
  0xa2   : > { %v587_v28 = vadd.f32 %v585_v23, %v564_v24  ;;  %v392_v58 = vadd.f32 %v390_v55, %v369_v54  ;;  %v464_v2 = vsel %vm458_vm10, %v1107_v61, %v462_v62  ;;  %v1109_v3 = vadd.s32 4294967289, %v475_v63 }
  0xa3   : > { %v485_v4 = vsub.s32 37, %v475_v63  ;;  %vm481_vm12 = vcmp.lt.s32.totalorder %v475_v63, 23  ;;  %v448_v6 = vsel %vm445_vm11, %v1620_v45, 0.0  ;;  %vm468_vm13 = vcmp.eq.s32.totalorder %v464_v2, %v1529_v8 }
  0xa4   : > { %1164 = vmatprep.mubr.msk.f32.mxu1 %vm799_vm2, %v587_v28  ;;  %v415_v0 = vadd.f32 %v413_v60, %v392_v58  ;;  %v1111_v11 = vadd.s32 4294967289, %v498_v5  ;;  %v508_v12 = vsub.s32 37, %v498_v5  ;;  %v521_v13 = vadd.s32 12, %v1538_v9 }
  0xa5   : > { %v487_v10 = vsel %vm481_vm12, %v1109_v3, %v485_v4  ;;  %vm504_vm14 = vcmp.lt.s32.totalorder %v498_v5, 23  ;;  %v471_v44 = vsel %vm468_vm13, %v1625_v46, 0.0  ;;  %v544_v21 = vadd.s32 13, %v1538_v9 }
  0xa6   : > { %v436_v37 = vadd.f32 %v434_v36, %v415_v0  ;;  %vm491_vm15 = vcmp.eq.s32.totalorder %v487_v10, %v1529_v8  ;;  %v510_v15 = vsel %vm504_vm14, %v1111_v11, %v508_v12  ;;  %v1113_v16 = vadd.s32 4294967289, %v521_v13 }
  0xa7   : > { %v531_v18 = vsub.s32 37, %v521_v13  ;;  %vm527_vm0 = vcmp.lt.s32.totalorder %v521_v13, 23  ;;  %v494_v45 = vsel %vm491_vm15, %v1631_v50, 0.0  ;;  %vm514_vm1 = vcmp.eq.s32.totalorder %v510_v15, %v1529_v8 }
  0xa8   : > { %v450_v14 = vadd.f32 %v448_v6, %v436_v37  ;;  %v1115_v23 = vadd.s32 4294967289, %v544_v21  ;;  %v554_v24 = vsub.s32 37, %v544_v21  ;;  %v567_v28 = vadd.s32 14, %v1538_v9 }
  0xa9   : > { %v533_v22 = vsel %vm527_vm0, %v1113_v16, %v531_v18  ;;  %vm550_vm3 = vcmp.lt.s32.totalorder %v544_v21, 23  ;;  %v517_v46 = vsel %vm514_vm1, %v1633_v51, 0.0 }
  0xaa   : > { %v473_v7 = vadd.f32 %v471_v44, %v450_v14  ;;  %vm537_vm4 = vcmp.eq.s32.totalorder %v533_v22, %v1529_v8  ;;  %v556_v29 = vsel %vm550_vm3, %v1115_v23, %v554_v24  ;;  %v1117_v30 = vadd.s32 4294967289, %v567_v28 }
  0xab   : > { %v577_v31 = vsub.s32 37, %v567_v28  ;;  %vm573_vm5 = vcmp.lt.s32.totalorder %v567_v28, 23  ;;  %v540_v50 = vsel %vm537_vm4, %v1644_v59, 0.0  ;;  %vm560_vm6 = vcmp.eq.s32.totalorder %v556_v29, %v1529_v8  ;;  %v963_v59 = vld [vmem:[%s1504_s28 + $0x8] sm:$0xff] }
  0xac   : > { %v496_v19 = vadd.f32 %v494_v45, %v473_v7  ;;  %v563_v34 = vsel %vm560_vm6, %v1704_v1, 0.0 }
  0xad   : > { %v579_v33 = vsel %vm573_vm5, %v1117_v30, %v577_v31 }
  0xae   : > { %v519_v32 = vadd.f32 %v517_v46, %v496_v19  ;;  %vm583_vm7 = vcmp.eq.s32.totalorder %v579_v33, %v1529_v8 }
  0xaf   : > { %v586_v40 = vsel %vm583_vm7, %v1725_v43, 0.0 }
  0xb0   : > { %v542_v9 = vadd.f32 %v540_v50, %v519_v32 }
  0xb2   : > { %v565_v38 = vadd.f32 %v563_v34, %v542_v9 }
  0xb4   : > { %v588_v42 = vadd.f32 %v586_v40, %v565_v38 }
 0x15c   : > { %v1159_v51 = vpop.f32.mrb[0].mxu0 }
 0x15d   : > { %v872_v39 = vpop.f32.mrb[1].mxu0 }
 0x15e   : > { %v1171_v41 = vpack.c.bf16 %v1159_v51, %v872_v39 }
 0x160   : > { %1172 = vmatprep.subr.bf16.mxu1 %v1171_v41 }
 0x161   : > { %1174 = vmatpush3.bf16.msra.mxu1 %v1171_v41 }
 0x164   : > { %1165 = vmatmul.mubr.msk.f32.vlgmr.msra.gmra.mrb[0].mxu1 %vm799_vm2, %v588_v42 }
 0x237   : > { %v1166_v47 = vpop.f32.mrb[0].mxu1  ;;  %976 = sbr.rel (%p1137_p1) target bundleno = 574 (0x23e), region = 52 }
 0x238   : > { %v965_v17 = vmul.f32 %v1166_v47, %v963_v59  ;;  %v953_v1 = vpop.f32.mrb[1].mxu1 }
 0x239   : > { %v964_v8 = vmul.f32 %v962_v20, %v953_v1 }
 0x23a   : > { %v969_v49 = vadd.f32 %v967_v48, %v965_v17  ;;  %978 = vst.msk [vmem:[%s1506_s29 + $0x8] sm:$0xff] (!%p1137_p1), %vm799_vm2, %v965_v17 }
 0x23b   : > { %v968_v52 = vadd.f32 %v966_v25, %v964_v8  ;;  %977 = vst.msk [vmem:[%s1506_s29] sm:$0xff] (!%p1137_p1), %vm799_vm2, %v964_v8 }
 0x23c   : > { %971 = vst.msk [vmem:[#allocation2 + $0x8] sm:$0xff] %vm799_vm2, %v969_v49 }
 0x23d   : > { %970 = vst.msk [vmem:[#allocation2] sm:$0xff] %vm799_vm2, %v968_v52 }
 0x23e PF: > { %s1144_s12 = sshll.u32 %s1361_s18, 8  ;;  %s993_s17 = sshll.u32 %s1506_s29, 4  ;;  %s1849_s17 = int_to_ptr.vmem [resolvable:$true] %s993_s17 }
 0x23f   : > { %s1846_s11 = scalar_lea.hbm %s1908_s3, %s1144_s12  ;;  %s1918_s25 = sand.u32 1, %s1349_s15  }
 0x240   : > { %s1853_s4 = scalar_lea.sflag [#allocation6], %s1918_s25  ;;  %s1275_s0 = scalar_lea.vmem %s1849_s17, 256 }
 0x241   : > { %p1276_p2 = scmp.ne.s32.totalorder %s1849_s17, %s1275_s0  ;;  %s1377_s18 = smov [#allocation8]  }
 0x242   : > { %s1279_s10 = sshll.u32 %s1377_s18, 4  ;;  %s1280_s10 = int_to_ptr.vmem [resolvable:$false] %s1279_s10 }
 0x243   : > { %p1277_p4 = pnand %p1276_p2, %p1453_p3  ;;  %s1281_s6 = scalar_lea.vmem %s1280_s10, 512 }
 0x244   : > { %p1282_p6 = scmp.lt.s32.totalorder %s1849_s17, %s1280_s10  ;;  %p1283_p7 = scmp.lt.s32.totalorder %s1281_s6, %s1275_s0 }
 0x245   : > { %p1278_p5 = pneg %p1277_p4 }
 0x246   : > { %p1284_p8 = por %p1283_p7, %p1282_p6 }
 0x248   : > { %p1285_p11 = pnand %p1284_p8, %p1278_p5 }
 0x24a   : > { %1288 = shalt.err (!%p1285_p11)
}
 0x24b   : > { %s1289_s29 = scalar_lea.hbm %s1846_s11, 256  ;;  %s1293_s1 = scalar_lea.hbm %s1908_s3, 512 }
 0x24c   : > { %p1290_p9 = scmp.ne.s32.totalorder %s1846_s11, %s1289_s29  ;;  %p1294_p13 = scmp.lt.u32.totalorder %s1846_s11, %s1908_s3 }
 0x24d   : > { %p1295_p0 = scmp.lt.u32.totalorder %s1293_s1, %s1289_s29  ;;  %p1297_p2 = scmp.lt.u32.totalorder %s1289_s29, %s1846_s11 }
 0x24e   : > { %p1291_p10 = pnand %p1290_p9, %p1453_p3 }
 0x24f   : > { %p1296_p1 = por %p1295_p0, %p1294_p13 }
 0x250   : > { %p1292_p12 = pneg %p1291_p10 }
 0x251   : > { %p1298_p4 = por %p1297_p2, %p1296_p1 }
 0x253   : > { %p1299_p5 = pnand %p1298_p4, %p1292_p12 }
 0x255   : > { %1302 = shalt.err (!%p1299_p5)
}
 0x256   : > { %s1378_s22 = smov 128   ;;  %s1379_s30 = smov 8  }
 0x257   : > { %1179 = dma.vmem_to_hbm [thread:$0]  (%p1453_p3), %s1849_s17, 256, %s1846_s11, %s1853_s4, %s1378_s22, %s1378_s22, %s1379_s30  }
 0x258 PF: > { %p1191_p6 = scmp.ge.s32.totalorder %s1373_s21, 2  ;;  %s1008_s12 = sand.u32 1, %s1345_s14  }
 0x259   : > { %p1919_p7 = scmp.ne.s32.totalorder %s1913_s27, 0  ;;  %s1009_s28 = scalar_lea.sflag [#allocation6], %s1008_s12 }
 0x25b   : > { %p1186_p8 = pnand %p1191_p6, %p1919_p7 }
 0x25d   : > { %1340 = dma.done.wait (!%p1186_p8), %s1009_s28, 256  }
 0x25e   : > { %1342 = vsyncadd (!%p1186_p8), %s1009_s28, 4294967040  ;;  %s18_s21 = sadd.s32 1, %s1373_s21   ;;  %s1920_s14 = smov %s1349_s15 }
 0x25f   : > { %p15_p11 = scmp.ge.s32.totalorder %s18_s21, 14   ;;  %s1921_s15 = smov %s1353_s16 }
 0x260   : > { %s1922_s16 = smov %s1483_s7  ;;  %s1923_s17 = smov %s1365_s19 }
 0x261   : > { %s1924_s18 = smov %s1369_s20  ;;  %s1925_s19 = smov %s1928_s23 }
 0x262   : > { %s1926_s20 = smov %s1932_s24  ;;  %17 = sbr.rel (!%p15_p11) target bundleno = 10 (0xa), region = 88 }
 0x269   :  { %1014 = vsyncpa [#allocation6], 1 }
 0x26a   :  { %1016 = vsyncpa [#allocation6 + $0x1], 1 }
 0x26b   :  { %1017 = vsyncpa [#allocation7], 1 }
 0x26c   :  { %1019 = vsyncpa [#allocation7 + $0x1], 1 }

</bundles_post_ra>
